<compile_context>
chip_gen: v6e
topology: v6e:2x2x1
jax: 0.10.0
libtpu: 0.0.40
codegen_flags: <defaults>
</compile_context>

<pallas_src>
import jax
import jax.numpy as jnp
from jax.experimental import pallas as pl
from jax.experimental.pallas import tpu as pltpu


# ----------------------------------------------------------------------------
# Pallas kernel 1: pointwise Conv1d in NCW layout
#   out[b, n, t] = sum_c W[n, c] * x[b, c, t] + bias[n]
# (used once, with the encoder already folded into the GRU input projection)
# ----------------------------------------------------------------------------
def _pw_conv_kernel(x_ref, w_ref, b_ref, o_ref):
    # x_ref: (1, Cin, T) bf16, w_ref: (N, Cin) bf16, b_ref: (N, 1) f32
    acc = jnp.dot(w_ref[...], x_ref[0], preferred_element_type=jnp.float32)  # (N, T)
    o_ref[0] = (acc + b_ref[...]).astype(o_ref.dtype)


def pointwise_conv1d(x, w, b, out_dtype=jnp.float32):
    """x: (B, Cin, T), w: (N, Cin), b: (N,) -> (B, N, T).  bf16 MXU, f32 accum."""
    B, Cin, T = x.shape
    N = w.shape[0]
    return pl.pallas_call(
        _pw_conv_kernel,
        out_shape=jax.ShapeDtypeStruct((B, N, T), out_dtype),
        grid=(B,),
        in_specs=[
            pl.BlockSpec((1, Cin, T), lambda bb: (bb, 0, 0)),
            pl.BlockSpec((N, Cin), lambda bb: (0, 0)),
            pl.BlockSpec((N, 1), lambda bb: (0, 0)),
        ],
        out_specs=pl.BlockSpec((1, N, T), lambda bb: (bb, 0, 0)),
        compiler_params=pltpu.CompilerParams(dimension_semantics=("parallel",)),
    )(
        x.astype(jnp.bfloat16),
        w.astype(jnp.bfloat16),
        b.reshape(N, 1).astype(jnp.float32),
    )


# ----------------------------------------------------------------------------
# Pallas kernel 2: fused GRU recurrence + classifier head.
# grid=(T//TB,) "arbitrary": h (GRU state) and the Linear1 accumulator live in
# VMEM scratch across grid steps; W_hh / fc2 / fc3 are resident; gx and W1 are
# streamed TB timesteps at a time (double-buffered by BlockSpec).  Inside each
# grid step an unrolled fori_loop runs the TB sequential GRU updates.
# ----------------------------------------------------------------------------
def _make_gru_cls_kernel(tb):
    def kernel(gx_ref, whh_ref, bhh_ref, w1_ref, b1_ref,
               w2_ref, b2_ref, w3_ref, b3_ref, o_ref,
               h_scr, acc_scr):
        blk = pl.program_id(0)

        @pl.when(blk == 0)
        def _():
            h_scr[...] = jnp.zeros_like(h_scr)
            acc_scr[...] = jnp.zeros_like(acc_scr)

        # Hoisted once per grid step: resident gate weights (bf16) / biases (f32).
        whh_r = whh_ref[0]
        whh_z = whh_ref[1]
        whh_n = whh_ref[2]
        bh_r = bhh_ref[0]
        bh_z = bhh_ref[1]
        bh_n = bhh_ref[2]

        def step(i, carry):
            h = h_scr[...]                              # (B, C) f32
            h_b = h.astype(jnp.bfloat16)

            # hidden-to-hidden gate pre-activations (bf16 MXU, f32 accumulate)
            hr = jnp.dot(h_b, whh_r, preferred_element_type=jnp.float32) + bh_r
            hz = jnp.dot(h_b, whh_z, preferred_element_type=jnp.float32) + bh_z
            hn = jnp.dot(h_b, whh_n, preferred_element_type=jnp.float32) + bh_n

            # input-to-hidden gate pre-activations: precomputed, streamed, f32
            g = gx_ref[i]                               # (3, B, C) f32

            r = jax.nn.sigmoid(g[0] + hr)               # gate math in f32
            u = jax.nn.sigmoid(g[1] + hz)
            n = jnp.tanh(g[2] + r * hn)
            h_new = (1.0 - u) * n + u * h
            h_scr[...] = h_new

            # fc layer 1: running contraction over time of Flatten(c) @ W1.T
            acc_scr[...] += jnp.dot(h_new.astype(jnp.bfloat16), w1_ref[i],
                                    preferred_element_type=jnp.float32)
            return carry

        jax.lax.fori_loop(0, tb, step, 0, unroll=True)

        @pl.when(blk == pl.num_programs(0) - 1)
        def _():
            # ReLU; Dropout(p=0.2) is identity at inference.
            h1 = jnp.maximum(acc_scr[...] + b1_ref[...], 0.0)
            h2 = jnp.maximum(
                jnp.dot(h1.astype(jnp.bfloat16), w2_ref[...],
                        preferred_element_type=jnp.float32) + b2_ref[...], 0.0)
            o_ref[...] = (jnp.dot(h2.astype(jnp.bfloat16), w3_ref[...],
                                  preferred_element_type=jnp.float32)
                          + b3_ref[...]).astype(o_ref.dtype)

    return kernel


def _time_chunk(T, max_chunk=8):
    """Largest divisor of T not exceeding max_chunk (timesteps per grid step)."""
    for tb in range(min(T, max_chunk), 0, -1):
        if T % tb == 0:
            return tb
    return 1


def gru_classifier_head(gx, whh, bhh, w1, b1, w2, b2, w3, b3):
    """gx: (B, 3C, T) GRU input-gate pre-activations -> logits (B, num_cls)."""
    B, C3, T = gx.shape
    C = C3 // 3
    H1 = w1.shape[0]
    H2 = w2.shape[0]
    num_cls = w3.shape[0]
    TB = _time_chunk(T)

    # Layout plumbing done once on weights / the small gx tensor.  W1 is
    # re-ordered so the Flatten(c[B, z_dim, T]) contraction becomes a per-step
    # (B, C) @ (C, H1) accumulation -> no activation transpose ever needed.
    gx4 = gx.reshape(B, 3, C, T).transpose(3, 1, 0, 2)      # (T, 3, B, C)
    whh3 = whh.reshape(3, C, C).transpose(0, 2, 1)          # (3, C, C) = W_h*.T
    bhh3 = bhh.reshape(3, 1, C)
    w1_r = w1.reshape(H1, C, T).transpose(2, 1, 0)          # (T, C, H1)

    return pl.pallas_call(
        _make_gru_cls_kernel(TB),
        out_shape=jax.ShapeDtypeStruct((B, num_cls), jnp.float32),
        grid=(T // TB,),
        in_specs=[
            pl.BlockSpec((TB, 3, B, C), lambda t: (t, 0, 0, 0)),  # gx chunk, streamed
            pl.BlockSpec((3, C, C), lambda t: (0, 0, 0)),         # W_hh^T, resident
            pl.BlockSpec((3, 1, C), lambda t: (0, 0, 0)),         # b_hh, resident
            pl.BlockSpec((TB, C, H1), lambda t: (t, 0, 0)),       # W1 slabs, streamed
            pl.BlockSpec((1, H1), lambda t: (0, 0)),              # b1
            pl.BlockSpec((H1, H2), lambda t: (0, 0)),             # W2^T, resident
            pl.BlockSpec((1, H2), lambda t: (0, 0)),              # b2
            pl.BlockSpec((H2, num_cls), lambda t: (0, 0)),        # W3^T, resident
            pl.BlockSpec((1, num_cls), lambda t: (0, 0)),         # b3
        ],
        out_specs=pl.BlockSpec((B, num_cls), lambda t: (0, 0)),
        scratch_shapes=[
            pltpu.VMEM((B, C), jnp.float32),    # GRU hidden state
            pltpu.VMEM((B, H1), jnp.float32),   # fc1 accumulator
        ],
        compiler_params=pltpu.CompilerParams(
            dimension_semantics=("arbitrary",)),   # sequential recurrence
    )(
        gx4.astype(jnp.float32),
        whh3.astype(jnp.bfloat16),
        bhh3.astype(jnp.float32),
        w1_r.astype(jnp.bfloat16),
        b1.reshape(1, H1).astype(jnp.float32),
        w2.T.astype(jnp.bfloat16),
        b2.reshape(1, H2).astype(jnp.float32),
        w3.T.astype(jnp.bfloat16),
        b3.reshape(1, num_cls).astype(jnp.float32),
    )


# ----------------------------------------------------------------------------
# Classifier.forward
# ----------------------------------------------------------------------------
def classifier_forward(params, x):
    # encoder (pointwise Conv1d) and the GRU input-to-hidden projection are
    # both pointwise-linear, so fold them exactly (done in f32 on tiny weights):
    #   gx = Wih @ (W_enc @ x + b_enc) + bih = (Wih W_enc) @ x + (Wih b_enc + bih)
    Wih_eff = params["Wih"] @ params["W_enc"]                     # (3C, Cin)
    bih_eff = params["Wih"] @ params["b_enc"] + params["bih"]     # (3C,)
    gx = pointwise_conv1d(x, Wih_eff, bih_eff,
                          out_dtype=jnp.float32)                  # (B, 3C, T)
    # fused GRU recurrence + Flatten + fc head
    return gru_classifier_head(gx, params["Whh"], params["bhh"],
                               params["W1"], params["b1"],
                               params["W2"], params["b2"],
                               params["W3"], params["b3"])


# ----------------------------------------------------------------------------
# Pure-JAX (f32) reference for validation (keeps the unfolded two-stage form)
# ----------------------------------------------------------------------------
def classifier_forward_ref(params, x):
    B, Cin, T = x.shape
    C = params["W_enc"].shape[0]
    z = jnp.einsum("nc,bct->bnt", params["W_enc"], x) + params["b_enc"][None, :, None]
    Wih, Whh = params["Wih"], params["Whh"]
    bih, bhh = params["bih"], params["bhh"]

    def step(h, z_t):                       # z_t: (B, C)
        gx = z_t @ Wih.T + bih
        gh = h @ Whh.T + bhh
        xr, xz, xn = jnp.split(gx, 3, axis=-1)
        hr, hz, hn = jnp.split(gh, 3, axis=-1)
        r = jax.nn.sigmoid(xr + hr)
        u = jax.nn.sigmoid(xz + hz)
        n = jnp.tanh(xn + r * hn)
        h_new = (1.0 - u) * n + u * h
        return h_new, h_new

    h0 = jnp.zeros((B, C), jnp.float32)
    _, hs = jax.lax.scan(step, h0, jnp.transpose(z, (2, 0, 1)))   # (T, B, C)
    c = jnp.transpose(hs, (1, 2, 0))                              # (B, C, T)
    flat = c.reshape(B, C * T)                                    # nn.Flatten
    h1 = jnp.maximum(flat @ params["W1"].T + params["b1"], 0.0)
    h2 = jnp.maximum(h1 @ params["W2"].T + params["b2"], 0.0)
    return h2 @ params["W3"].T + params["b3"]


# ----------------------------------------------------------------------------
# Deterministic parameter init (PyTorch weight conventions)
# ----------------------------------------------------------------------------
def init_params(key, in_channels, z_dim, seq_len, num_cls, h1=256, h2=128):
    ks = jax.random.split(key, 6)

    def lin(k, shape, fan_in):
        return jax.random.normal(k, shape, jnp.float32) / jnp.sqrt(fan_in)

    return {
        # encoder: pointwise Conv1d
        "W_enc": lin(ks[0], (z_dim, in_channels), in_channels),
        "b_enc": jnp.zeros((z_dim,), jnp.float32),
        # aggregator: single-layer GRU (gate order r, z, n as in torch)
        "Wih": lin(ks[1], (3 * z_dim, z_dim), z_dim),
        "Whh": lin(ks[2], (3 * z_dim, z_dim), z_dim),
        "bih": jnp.zeros((3 * z_dim,), jnp.float32),
        "bhh": jnp.zeros((3 * z_dim,), jnp.float32),
        # classifier head (widths 256 / 128 fixed by build_classifier)
        "W1": lin(ks[3], (h1, z_dim * seq_len), z_dim * seq_len),
        "b1": jnp.zeros((h1,), jnp.float32),
        "W2": lin(ks[4], (h2, h1), h1),
        "b2": jnp.zeros((h2,), jnp.float32),
        "W3": lin(ks[5], (num_cls, h2), h2),
        "b3": jnp.zeros((num_cls,), jnp.float32),
    }


if __name__ == "__main__":
    B, Cin, T = 2, 4, 16          # batch, input channels, seq_len
    z_dim, num_cls = 32, 6

    key = jax.random.PRNGKey(0)
    k_x, k_p = jax.random.split(key)
    x = jax.random.normal(k_x, (B, Cin, T), jnp.float32)
    params = init_params(k_p, Cin, z_dim, T, num_cls)

    fwd = jax.jit(classifier_forward)
    pred = fwd(params, x)
    jax.block_until_ready(pred)

    assert pred.shape == (B, num_cls), pred.shape

    # validate bf16-MXU / f32-accumulation kernels against a pure-JAX f32 ref
    ref = classifier_forward_ref(params, x)
    rel_err = float(jnp.linalg.norm(pred - ref) / (jnp.linalg.norm(ref) + 1e-8))
    assert rel_err < 0.1, f"mismatch vs reference: rel_err={rel_err}"

    print("KERNEL_OK")
</pallas_src>

<mosaic_0001>
module attributes {stable_mosaic.version = 11 : i64} {
  func.func @_pw_conv_kernel(%arg0: i32, %arg1: memref<1x4x16xbf16, #tpu.memory_space<vmem>>, %arg2: memref<96x4xbf16, #tpu.memory_space<vmem>>, %arg3: memref<96x1xf32, #tpu.memory_space<vmem>>, %arg4: memref<1x96x16xf32, #tpu.memory_space<vmem>>) attributes {dimension_semantics = [#tpu.dimension_semantics<parallel>], iteration_bounds = array<i64: 2>, scalar_prefetch = 0 : i64, scratch_operands = 0 : i64, tpu.core_type = #tpu.core_type<tc>, window_params = [{transform_indices = @transform_0, window_bounds = array<i64: 1, 4, 16>}, {pipeline_mode = #tpu.pipeline_mode<synchronous>, transform_indices = @transform_1, window_bounds = array<i64: 96, 4>}, {pipeline_mode = #tpu.pipeline_mode<synchronous>, transform_indices = @transform_2, window_bounds = array<i64: 96, 1>}, {transform_indices = @transform_3, window_bounds = array<i64: 1, 96, 16>}]} {
    %c0 = arith.constant 0 : index
    %c0_0 = arith.constant 0 : index
    %0 = vector.load %arg2[%c0, %c0_0] : memref<96x4xbf16, #tpu.memory_space<vmem>>, vector<96x4xbf16>
    %c0_1 = arith.constant 0 : index
    %c0_2 = arith.constant 0 : index
    %c0_3 = arith.constant 0 : index
    %1 = vector.load %arg1[%c0_1, %c0_2, %c0_3] : memref<1x4x16xbf16, #tpu.memory_space<vmem>>, vector<1x4x16xbf16>
    %2 = vector.shape_cast %1 : vector<1x4x16xbf16> to vector<4x16xbf16>
    %cst = arith.constant dense<0.000000e+00> : vector<96x16xf32>
    %3 = tpu.matmul %0, %2, %cst {dimension_numbers = #tpu.dot_dimension_numbers<[1], [0], [0], [1], [0, 0, 1, 1], [], []>} : vector<96x4xbf16>, vector<4x16xbf16>, vector<96x16xf32> -> vector<96x16xf32>
    %c0_4 = arith.constant 0 : index
    %c0_5 = arith.constant 0 : index
    %4 = vector.load %arg3[%c0_4, %c0_5] : memref<96x1xf32, #tpu.memory_space<vmem>>, vector<96x1xf32>
    %5 = vector.broadcast %4 : vector<96x1xf32> to vector<96x16xf32>
    %6 = arith.addf %3, %5 : vector<96x16xf32>
    %c0_6 = arith.constant 0 : index
    %c0_7 = arith.constant 0 : index
    %c0_8 = arith.constant 0 : index
    %7 = vector.load %arg4[%c0_6, %c0_7, %c0_8] : memref<1x96x16xf32, #tpu.memory_space<vmem>>, vector<1x96x16xf32>
    %8 = vector.shape_cast %7 : vector<1x96x16xf32> to vector<96x16xf32>
    %9 = vector.shape_cast %6 : vector<96x16xf32> to vector<1x96x16xf32>
    tpu.vector_store %arg4[%c0_6, %c0_7, %c0_8], %9 {strides = array<i32>} : memref<1x96x16xf32, #tpu.memory_space<vmem>>, vector<1x96x16xf32>,
    return
  }
  func.func @transform_0(%arg0: i32) -> (i32, i32, i32) {
    %c0_i32 = arith.constant 0 : i32
    %c0_i32_0 = arith.constant 0 : i32
    %c0_i32_1 = arith.constant 0 : i32
    return %arg0, %c0_i32, %c0_i32_0 : i32, i32, i32
  }
  func.func @transform_1(%arg0: i32) -> (i32, i32) {
    %c0_i32 = arith.constant 0 : i32
    %c0_i32_0 = arith.constant 0 : i32
    %c0_i32_1 = arith.constant 0 : i32
    return %c0_i32, %c0_i32_0 : i32, i32
  }
  func.func @transform_2(%arg0: i32) -> (i32, i32) {
    %c0_i32 = arith.constant 0 : i32
    %c0_i32_0 = arith.constant 0 : i32
    %c0_i32_1 = arith.constant 0 : i32
    return %c0_i32, %c0_i32_0 : i32, i32
  }
  func.func @transform_3(%arg0: i32) -> (i32, i32, i32) {
    %c0_i32 = arith.constant 0 : i32
    %c0_i32_0 = arith.constant 0 : i32
    %c0_i32_1 = arith.constant 0 : i32
    return %arg0, %c0_i32, %c0_i32_0 : i32, i32, i32
  }
}

module attributes {stable_mosaic.version = 11 : i64} {
  func.func @kernel(%arg0: i32, %arg1: memref<8x3x2x32xf32, #tpu.memory_space<vmem>>, %arg2: memref<3x32x32xbf16, #tpu.memory_space<vmem>>, %arg3: memref<3x1x32xf32, #tpu.memory_space<vmem>>, %arg4: memref<8x32x256xbf16, #tpu.memory_space<vmem>>, %arg5: memref<1x256xf32, #tpu.memory_space<vmem>>, %arg6: memref<256x128xbf16, #tpu.memory_space<vmem>>, %arg7: memref<1x128xf32, #tpu.memory_space<vmem>>, %arg8: memref<128x6xbf16, #tpu.memory_space<vmem>>, %arg9: memref<1x6xf32, #tpu.memory_space<vmem>>, %arg10: memref<2x6xf32, #tpu.memory_space<vmem>>, %arg11: memref<2x32xf32, #tpu.memory_space<vmem>>, %arg12: memref<2x256xf32, #tpu.memory_space<vmem>>) attributes {dimension_semantics = [#tpu.dimension_semantics<arbitrary>], iteration_bounds = array<i64: 2>, scalar_prefetch = 0 : i64, scratch_operands = 2 : i64, tpu.core_type = #tpu.core_type<tc>, window_params = [{transform_indices = @transform_0, window_bounds = array<i64: 8, 3, 2, 32>}, {pipeline_mode = #tpu.pipeline_mode<synchronous>, transform_indices = @transform_1, window_bounds = array<i64: 3, 32, 32>}, {pipeline_mode = #tpu.pipeline_mode<synchronous>, transform_indices = @transform_2, window_bounds = array<i64: 3, 1, 32>}, {transform_indices = @transform_3, window_bounds = array<i64: 8, 32, 256>}, {pipeline_mode = #tpu.pipeline_mode<synchronous>, transform_indices = @transform_4, window_bounds = array<i64: 1, 256>}, {pipeline_mode = #tpu.pipeline_mode<synchronous>, transform_indices = @transform_5, window_bounds = array<i64: 256, 128>}, {pipeline_mode = #tpu.pipeline_mode<synchronous>, transform_indices = @transform_6, window_bounds = array<i64: 1, 128>}, {pipeline_mode = #tpu.pipeline_mode<synchronous>, transform_indices = @transform_7, window_bounds = array<i64: 128, 6>}, {pipeline_mode = #tpu.pipeline_mode<synchronous>, transform_indices = @transform_8, window_bounds = array<i64: 1, 6>}, {pipeline_mode = #tpu.pipeline_mode<synchronous>, transform_indices = @transform_9, window_bounds = array<i64: 2, 6>}]} {
    %c0_i32 = arith.constant 0 : i32
    %0 = arith.cmpi eq, %arg0, %c0_i32 : i32
    %1 = arith.extui %0 : i1 to i32
    %c0_i32_0 = arith.constant 0 : i32
    %2 = arith.cmpi ne, %1, %c0_i32_0 : i32
    scf.if %2 {
      %cst_178 = arith.constant 0.000000e+00 : f32
      %410 = vector.broadcast %cst_178 : f32 to vector<2x32xf32>
      %c0_179 = arith.constant 0 : index
      %c0_180 = arith.constant 0 : index
      %411 = vector.load %arg11[%c0_179, %c0_180] : memref<2x32xf32, #tpu.memory_space<vmem>>, vector<2x32xf32>
      tpu.vector_store %arg11[%c0_179, %c0_180], %410 {strides = array<i32>} : memref<2x32xf32, #tpu.memory_space<vmem>>, vector<2x32xf32>,
      %cst_181 = arith.constant 0.000000e+00 : f32
      %412 = vector.broadcast %cst_181 : f32 to vector<2x256xf32>
      %c0_182 = arith.constant 0 : index
      %c0_183 = arith.constant 0 : index
      %413 = vector.load %arg12[%c0_182, %c0_183] : memref<2x256xf32, #tpu.memory_space<vmem>>, vector<2x256xf32>
      tpu.vector_store %arg12[%c0_182, %c0_183], %412 {strides = array<i32>} : memref<2x256xf32, #tpu.memory_space<vmem>>, vector<2x256xf32>,
    } else {
    }
    %c0 = arith.constant 0 : index
    %c0_1 = arith.constant 0 : index
    %c0_2 = arith.constant 0 : index
    %3 = vector.load %arg2[%c0, %c0_1, %c0_2] : memref<3x32x32xbf16, #tpu.memory_space<vmem>>, vector<1x32x32xbf16>
    %4 = vector.shape_cast %3 : vector<1x32x32xbf16> to vector<32x32xbf16>
    %c1 = arith.constant 1 : index
    %c0_3 = arith.constant 0 : index
    %c0_4 = arith.constant 0 : index
    %5 = vector.load %arg2[%c1, %c0_3, %c0_4] : memref<3x32x32xbf16, #tpu.memory_space<vmem>>, vector<1x32x32xbf16>
    %6 = vector.shape_cast %5 : vector<1x32x32xbf16> to vector<32x32xbf16>
    %c2 = arith.constant 2 : index
    %c0_5 = arith.constant 0 : index
    %c0_6 = arith.constant 0 : index
    %7 = vector.load %arg2[%c2, %c0_5, %c0_6] : memref<3x32x32xbf16, #tpu.memory_space<vmem>>, vector<1x32x32xbf16>
    %8 = vector.shape_cast %7 : vector<1x32x32xbf16> to vector<32x32xbf16>
    %c0_7 = arith.constant 0 : index
    %c0_8 = arith.constant 0 : index
    %c0_9 = arith.constant 0 : index
    %9 = vector.load %arg3[%c0_7, %c0_8, %c0_9] : memref<3x1x32xf32, #tpu.memory_space<vmem>>, vector<1x1x32xf32>
    %10 = vector.shape_cast %9 : vector<1x1x32xf32> to vector<1x32xf32>
    %c1_10 = arith.constant 1 : index
    %c0_11 = arith.constant 0 : index
    %c0_12 = arith.constant 0 : index
    %11 = vector.load %arg3[%c1_10, %c0_11, %c0_12] : memref<3x1x32xf32, #tpu.memory_space<vmem>>, vector<1x1x32xf32>
    %12 = vector.shape_cast %11 : vector<1x1x32xf32> to vector<1x32xf32>
    %c2_13 = arith.constant 2 : index
    %c0_14 = arith.constant 0 : index
    %c0_15 = arith.constant 0 : index
    %13 = vector.load %arg3[%c2_13, %c0_14, %c0_15] : memref<3x1x32xf32, #tpu.memory_space<vmem>>, vector<1x1x32xf32>
    %14 = vector.shape_cast %13 : vector<1x1x32xf32> to vector<1x32xf32>
    %c0_i32_16 = arith.constant 0 : i32
    %c0_17 = arith.constant 0 : index
    %c0_18 = arith.constant 0 : index
    %15 = vector.load %arg11[%c0_17, %c0_18] : memref<2x32xf32, #tpu.memory_space<vmem>>, vector<2x32xf32>
    %16 = arith.truncf %15 : vector<2x32xf32> to vector<2x32xbf16>
    %cst = arith.constant dense<0.000000e+00> : vector<2x32xf32>
    %17 = tpu.matmul %16, %4, %cst {dimension_numbers = #tpu.dot_dimension_numbers<[1], [0], [0], [1], [0, 0, 1, 1], [], []>} : vector<2x32xbf16>, vector<32x32xbf16>, vector<2x32xf32> -> vector<2x32xf32>
    %18 = vector.broadcast %10 : vector<1x32xf32> to vector<2x32xf32>
    %19 = arith.addf %17, %18 : vector<2x32xf32>
    %cst_19 = arith.constant dense<0.000000e+00> : vector<2x32xf32>
    %20 = tpu.matmul %16, %6, %cst_19 {dimension_numbers = #tpu.dot_dimension_numbers<[1], [0], [0], [1], [0, 0, 1, 1], [], []>} : vector<2x32xbf16>, vector<32x32xbf16>, vector<2x32xf32> -> vector<2x32xf32>
    %21 = vector.broadcast %12 : vector<1x32xf32> to vector<2x32xf32>
    %22 = arith.addf %20, %21 : vector<2x32xf32>
    %cst_20 = arith.constant dense<0.000000e+00> : vector<2x32xf32>
    %23 = tpu.matmul %16, %8, %cst_20 {dimension_numbers = #tpu.dot_dimension_numbers<[1], [0], [0], [1], [0, 0, 1, 1], [], []>} : vector<2x32xbf16>, vector<32x32xbf16>, vector<2x32xf32> -> vector<2x32xf32>
    %24 = vector.broadcast %14 : vector<1x32xf32> to vector<2x32xf32>
    %25 = arith.addf %23, %24 : vector<2x32xf32>
    %26 = arith.index_cast %c0_i32_16 : i32 to index
    %c0_21 = arith.constant 0 : index
    %c0_22 = arith.constant 0 : index
    %c0_23 = arith.constant 0 : index
    %27 = vector.load %arg1[%26, %c0_21, %c0_22, %c0_23] : memref<8x3x2x32xf32, #tpu.memory_space<vmem>>, vector<1x3x2x32xf32>
    %28 = vector.shape_cast %27 : vector<1x3x2x32xf32> to vector<3x2x32xf32>
    %29 = vector.extract_strided_slice %28 {offsets = [0, 0, 0], sizes = [1, 2, 32], strides = [1, 1, 1]} : vector<3x2x32xf32> to vector<1x2x32xf32>
    %30 = vector.shape_cast %29 : vector<1x2x32xf32> to vector<2x32xf32>
    %31 = arith.addf %30, %19 : vector<2x32xf32>
    %32 = arith.negf %31 : vector<2x32xf32>
    %33 = math.exp %32 : vector<2x32xf32>
    %cst_24 = arith.constant 1.000000e+00 : f32
    %34 = vector.broadcast %cst_24 : f32 to vector<2x32xf32>
    %35 = arith.addf %34, %33 : vector<2x32xf32>
    %36 = arith.divf %34, %35 : vector<2x32xf32>
    %37 = vector.extract_strided_slice %28 {offsets = [1, 0, 0], sizes = [1, 2, 32], strides = [1, 1, 1]} : vector<3x2x32xf32> to vector<1x2x32xf32>
    %38 = vector.shape_cast %37 : vector<1x2x32xf32> to vector<2x32xf32>
    %39 = arith.addf %38, %22 : vector<2x32xf32>
    %40 = arith.negf %39 : vector<2x32xf32>
    %41 = math.exp %40 : vector<2x32xf32>
    %cst_25 = arith.constant 1.000000e+00 : f32
    %42 = vector.broadcast %cst_25 : f32 to vector<2x32xf32>
    %43 = arith.addf %42, %41 : vector<2x32xf32>
    %44 = arith.divf %42, %43 : vector<2x32xf32>
    %45 = vector.extract_strided_slice %28 {offsets = [2, 0, 0], sizes = [1, 2, 32], strides = [1, 1, 1]} : vector<3x2x32xf32> to vector<1x2x32xf32>
    %46 = vector.shape_cast %45 : vector<1x2x32xf32> to vector<2x32xf32>
    %47 = arith.mulf %36, %25 : vector<2x32xf32>
    %48 = arith.addf %46, %47 : vector<2x32xf32>
    %49 = math.tanh %48 : vector<2x32xf32>
    %cst_26 = arith.constant 1.000000e+00 : f32
    %50 = vector.broadcast %cst_26 : f32 to vector<2x32xf32>
    %51 = arith.subf %50, %44 : vector<2x32xf32>
    %52 = arith.mulf %51, %49 : vector<2x32xf32>
    %53 = arith.mulf %44, %15 : vector<2x32xf32>
    %54 = arith.addf %52, %53 : vector<2x32xf32>
    %c0_27 = arith.constant 0 : index
    %c0_28 = arith.constant 0 : index
    %55 = vector.load %arg11[%c0_27, %c0_28] : memref<2x32xf32, #tpu.memory_space<vmem>>, vector<2x32xf32>
    tpu.vector_store %arg11[%c0_27, %c0_28], %54 {strides = array<i32>} : memref<2x32xf32, #tpu.memory_space<vmem>>, vector<2x32xf32>,
    %c0_29 = arith.constant 0 : index
    %c0_30 = arith.constant 0 : index
    %56 = vector.load %arg12[%c0_29, %c0_30] : memref<2x256xf32, #tpu.memory_space<vmem>>, vector<2x256xf32>
    %57 = arith.truncf %54 : vector<2x32xf32> to vector<2x32xbf16>
    %58 = arith.index_cast %c0_i32_16 : i32 to index
    %c0_31 = arith.constant 0 : index
    %c0_32 = arith.constant 0 : index
    %59 = vector.load %arg4[%58, %c0_31, %c0_32] : memref<8x32x256xbf16, #tpu.memory_space<vmem>>, vector<1x32x256xbf16>
    %60 = vector.shape_cast %59 : vector<1x32x256xbf16> to vector<32x256xbf16>
    %cst_33 = arith.constant dense<0.000000e+00> : vector<2x256xf32>
    %61 = tpu.matmul %57, %60, %cst_33 {dimension_numbers = #tpu.dot_dimension_numbers<[1], [0], [0], [1], [0, 0, 1, 1], [], []>} : vector<2x32xbf16>, vector<32x256xbf16>, vector<2x256xf32> -> vector<2x256xf32>
    %62 = arith.addf %56, %61 : vector<2x256xf32>
    %c0_34 = arith.constant 0 : index
    %c0_35 = arith.constant 0 : index
    %63 = vector.load %arg12[%c0_34, %c0_35] : memref<2x256xf32, #tpu.memory_space<vmem>>, vector<2x256xf32>
    tpu.vector_store %arg12[%c0_34, %c0_35], %62 {strides = array<i32>} : memref<2x256xf32, #tpu.memory_space<vmem>>, vector<2x256xf32>,
    %c1_i32 = arith.constant 1 : i32
    %c0_36 = arith.constant 0 : index
    %c0_37 = arith.constant 0 : index
    %64 = vector.load %arg11[%c0_36, %c0_37] : memref<2x32xf32, #tpu.memory_space<vmem>>, vector<2x32xf32>
    %65 = arith.truncf %64 : vector<2x32xf32> to vector<2x32xbf16>
    %cst_38 = arith.constant dense<0.000000e+00> : vector<2x32xf32>
    %66 = tpu.matmul %65, %4, %cst_38 {dimension_numbers = #tpu.dot_dimension_numbers<[1], [0], [0], [1], [0, 0, 1, 1], [], []>} : vector<2x32xbf16>, vector<32x32xbf16>, vector<2x32xf32> -> vector<2x32xf32>
    %67 = vector.broadcast %10 : vector<1x32xf32> to vector<2x32xf32>
    %68 = arith.addf %66, %67 : vector<2x32xf32>
    %cst_39 = arith.constant dense<0.000000e+00> : vector<2x32xf32>
    %69 = tpu.matmul %65, %6, %cst_39 {dimension_numbers = #tpu.dot_dimension_numbers<[1], [0], [0], [1], [0, 0, 1, 1], [], []>} : vector<2x32xbf16>, vector<32x32xbf16>, vector<2x32xf32> -> vector<2x32xf32>
    %70 = vector.broadcast %12 : vector<1x32xf32> to vector<2x32xf32>
    %71 = arith.addf %69, %70 : vector<2x32xf32>
    %cst_40 = arith.constant dense<0.000000e+00> : vector<2x32xf32>
    %72 = tpu.matmul %65, %8, %cst_40 {dimension_numbers = #tpu.dot_dimension_numbers<[1], [0], [0], [1], [0, 0, 1, 1], [], []>} : vector<2x32xbf16>, vector<32x32xbf16>, vector<2x32xf32> -> vector<2x32xf32>
    %73 = vector.broadcast %14 : vector<1x32xf32> to vector<2x32xf32>
    %74 = arith.addf %72, %73 : vector<2x32xf32>
    %75 = arith.index_cast %c1_i32 : i32 to index
    %c0_41 = arith.constant 0 : index
    %c0_42 = arith.constant 0 : index
    %c0_43 = arith.constant 0 : index
    %76 = vector.load %arg1[%75, %c0_41, %c0_42, %c0_43] : memref<8x3x2x32xf32, #tpu.memory_space<vmem>>, vector<1x3x2x32xf32>
    %77 = vector.shape_cast %76 : vector<1x3x2x32xf32> to vector<3x2x32xf32>
    %78 = vector.extract_strided_slice %77 {offsets = [0, 0, 0], sizes = [1, 2, 32], strides = [1, 1, 1]} : vector<3x2x32xf32> to vector<1x2x32xf32>
    %79 = vector.shape_cast %78 : vector<1x2x32xf32> to vector<2x32xf32>
    %80 = arith.addf %79, %68 : vector<2x32xf32>
    %81 = arith.negf %80 : vector<2x32xf32>
    %82 = math.exp %81 : vector<2x32xf32>
    %cst_44 = arith.constant 1.000000e+00 : f32
    %83 = vector.broadcast %cst_44 : f32 to vector<2x32xf32>
    %84 = arith.addf %83, %82 : vector<2x32xf32>
    %85 = arith.divf %83, %84 : vector<2x32xf32>
    %86 = vector.extract_strided_slice %77 {offsets = [1, 0, 0], sizes = [1, 2, 32], strides = [1, 1, 1]} : vector<3x2x32xf32> to vector<1x2x32xf32>
    %87 = vector.shape_cast %86 : vector<1x2x32xf32> to vector<2x32xf32>
    %88 = arith.addf %87, %71 : vector<2x32xf32>
    %89 = arith.negf %88 : vector<2x32xf32>
    %90 = math.exp %89 : vector<2x32xf32>
    %cst_45 = arith.constant 1.000000e+00 : f32
    %91 = vector.broadcast %cst_45 : f32 to vector<2x32xf32>
    %92 = arith.addf %91, %90 : vector<2x32xf32>
    %93 = arith.divf %91, %92 : vector<2x32xf32>
    %94 = vector.extract_strided_slice %77 {offsets = [2, 0, 0], sizes = [1, 2, 32], strides = [1, 1, 1]} : vector<3x2x32xf32> to vector<1x2x32xf32>
    %95 = vector.shape_cast %94 : vector<1x2x32xf32> to vector<2x32xf32>
    %96 = arith.mulf %85, %74 : vector<2x32xf32>
    %97 = arith.addf %95, %96 : vector<2x32xf32>
    %98 = math.tanh %97 : vector<2x32xf32>
    %cst_46 = arith.constant 1.000000e+00 : f32
    %99 = vector.broadcast %cst_46 : f32 to vector<2x32xf32>
    %100 = arith.subf %99, %93 : vector<2x32xf32>
    %101 = arith.mulf %100, %98 : vector<2x32xf32>
    %102 = arith.mulf %93, %64 : vector<2x32xf32>
    %103 = arith.addf %101, %102 : vector<2x32xf32>
    %c0_47 = arith.constant 0 : index
    %c0_48 = arith.constant 0 : index
    %104 = vector.load %arg11[%c0_47, %c0_48] : memref<2x32xf32, #tpu.memory_space<vmem>>, vector<2x32xf32>
    tpu.vector_store %arg11[%c0_47, %c0_48], %103 {strides = array<i32>} : memref<2x32xf32, #tpu.memory_space<vmem>>, vector<2x32xf32>,
    %c0_49 = arith.constant 0 : index
    %c0_50 = arith.constant 0 : index
    %105 = vector.load %arg12[%c0_49, %c0_50] : memref<2x256xf32, #tpu.memory_space<vmem>>, vector<2x256xf32>
    %106 = arith.truncf %103 : vector<2x32xf32> to vector<2x32xbf16>
    %107 = arith.index_cast %c1_i32 : i32 to index
    %c0_51 = arith.constant 0 : index
    %c0_52 = arith.constant 0 : index
    %108 = vector.load %arg4[%107, %c0_51, %c0_52] : memref<8x32x256xbf16, #tpu.memory_space<vmem>>, vector<1x32x256xbf16>
    %109 = vector.shape_cast %108 : vector<1x32x256xbf16> to vector<32x256xbf16>
    %cst_53 = arith.constant dense<0.000000e+00> : vector<2x256xf32>
    %110 = tpu.matmul %106, %109, %cst_53 {dimension_numbers = #tpu.dot_dimension_numbers<[1], [0], [0], [1], [0, 0, 1, 1], [], []>} : vector<2x32xbf16>, vector<32x256xbf16>, vector<2x256xf32> -> vector<2x256xf32>
    %111 = arith.addf %105, %110 : vector<2x256xf32>
    %c0_54 = arith.constant 0 : index
    %c0_55 = arith.constant 0 : index
    %112 = vector.load %arg12[%c0_54, %c0_55] : memref<2x256xf32, #tpu.memory_space<vmem>>, vector<2x256xf32>
    tpu.vector_store %arg12[%c0_54, %c0_55], %111 {strides = array<i32>} : memref<2x256xf32, #tpu.memory_space<vmem>>, vector<2x256xf32>,
    %c2_i32 = arith.constant 2 : i32
    %c0_56 = arith.constant 0 : index
    %c0_57 = arith.constant 0 : index
    %113 = vector.load %arg11[%c0_56, %c0_57] : memref<2x32xf32, #tpu.memory_space<vmem>>, vector<2x32xf32>
    %114 = arith.truncf %113 : vector<2x32xf32> to vector<2x32xbf16>
    %cst_58 = arith.constant dense<0.000000e+00> : vector<2x32xf32>
    %115 = tpu.matmul %114, %4, %cst_58 {dimension_numbers = #tpu.dot_dimension_numbers<[1], [0], [0], [1], [0, 0, 1, 1], [], []>} : vector<2x32xbf16>, vector<32x32xbf16>, vector<2x32xf32> -> vector<2x32xf32>
    %116 = vector.broadcast %10 : vector<1x32xf32> to vector<2x32xf32>
    %117 = arith.addf %115, %116 : vector<2x32xf32>
    %cst_59 = arith.constant dense<0.000000e+00> : vector<2x32xf32>
    %118 = tpu.matmul %114, %6, %cst_59 {dimension_numbers = #tpu.dot_dimension_numbers<[1], [0], [0], [1], [0, 0, 1, 1], [], []>} : vector<2x32xbf16>, vector<32x32xbf16>, vector<2x32xf32> -> vector<2x32xf32>
    %119 = vector.broadcast %12 : vector<1x32xf32> to vector<2x32xf32>
    %120 = arith.addf %118, %119 : vector<2x32xf32>
    %cst_60 = arith.constant dense<0.000000e+00> : vector<2x32xf32>
    %121 = tpu.matmul %114, %8, %cst_60 {dimension_numbers = #tpu.dot_dimension_numbers<[1], [0], [0], [1], [0, 0, 1, 1], [], []>} : vector<2x32xbf16>, vector<32x32xbf16>, vector<2x32xf32> -> vector<2x32xf32>
    %122 = vector.broadcast %14 : vector<1x32xf32> to vector<2x32xf32>
    %123 = arith.addf %121, %122 : vector<2x32xf32>
    %124 = arith.index_cast %c2_i32 : i32 to index
    %c0_61 = arith.constant 0 : index
    %c0_62 = arith.constant 0 : index
    %c0_63 = arith.constant 0 : index
    %125 = vector.load %arg1[%124, %c0_61, %c0_62, %c0_63] : memref<8x3x2x32xf32, #tpu.memory_space<vmem>>, vector<1x3x2x32xf32>
    %126 = vector.shape_cast %125 : vector<1x3x2x32xf32> to vector<3x2x32xf32>
    %127 = vector.extract_strided_slice %126 {offsets = [0, 0, 0], sizes = [1, 2, 32], strides = [1, 1, 1]} : vector<3x2x32xf32> to vector<1x2x32xf32>
    %128 = vector.shape_cast %127 : vector<1x2x32xf32> to vector<2x32xf32>
    %129 = arith.addf %128, %117 : vector<2x32xf32>
    %130 = arith.negf %129 : vector<2x32xf32>
    %131 = math.exp %130 : vector<2x32xf32>
    %cst_64 = arith.constant 1.000000e+00 : f32
    %132 = vector.broadcast %cst_64 : f32 to vector<2x32xf32>
    %133 = arith.addf %132, %131 : vector<2x32xf32>
    %134 = arith.divf %132, %133 : vector<2x32xf32>
    %135 = vector.extract_strided_slice %126 {offsets = [1, 0, 0], sizes = [1, 2, 32], strides = [1, 1, 1]} : vector<3x2x32xf32> to vector<1x2x32xf32>
    %136 = vector.shape_cast %135 : vector<1x2x32xf32> to vector<2x32xf32>
    %137 = arith.addf %136, %120 : vector<2x32xf32>
    %138 = arith.negf %137 : vector<2x32xf32>
    %139 = math.exp %138 : vector<2x32xf32>
    %cst_65 = arith.constant 1.000000e+00 : f32
    %140 = vector.broadcast %cst_65 : f32 to vector<2x32xf32>
    %141 = arith.addf %140, %139 : vector<2x32xf32>
    %142 = arith.divf %140, %141 : vector<2x32xf32>
    %143 = vector.extract_strided_slice %126 {offsets = [2, 0, 0], sizes = [1, 2, 32], strides = [1, 1, 1]} : vector<3x2x32xf32> to vector<1x2x32xf32>
    %144 = vector.shape_cast %143 : vector<1x2x32xf32> to vector<2x32xf32>
    %145 = arith.mulf %134, %123 : vector<2x32xf32>
    %146 = arith.addf %144, %145 : vector<2x32xf32>
    %147 = math.tanh %146 : vector<2x32xf32>
    %cst_66 = arith.constant 1.000000e+00 : f32
    %148 = vector.broadcast %cst_66 : f32 to vector<2x32xf32>
    %149 = arith.subf %148, %142 : vector<2x32xf32>
    %150 = arith.mulf %149, %147 : vector<2x32xf32>
    %151 = arith.mulf %142, %113 : vector<2x32xf32>
    %152 = arith.addf %150, %151 : vector<2x32xf32>
    %c0_67 = arith.constant 0 : index
    %c0_68 = arith.constant 0 : index
    %153 = vector.load %arg11[%c0_67, %c0_68] : memref<2x32xf32, #tpu.memory_space<vmem>>, vector<2x32xf32>
    tpu.vector_store %arg11[%c0_67, %c0_68], %152 {strides = array<i32>} : memref<2x32xf32, #tpu.memory_space<vmem>>, vector<2x32xf32>,
    %c0_69 = arith.constant 0 : index
    %c0_70 = arith.constant 0 : index
    %154 = vector.load %arg12[%c0_69, %c0_70] : memref<2x256xf32, #tpu.memory_space<vmem>>, vector<2x256xf32>
    %155 = arith.truncf %152 : vector<2x32xf32> to vector<2x32xbf16>
    %156 = arith.index_cast %c2_i32 : i32 to index
    %c0_71 = arith.constant 0 : index
    %c0_72 = arith.constant 0 : index
    %157 = vector.load %arg4[%156, %c0_71, %c0_72] : memref<8x32x256xbf16, #tpu.memory_space<vmem>>, vector<1x32x256xbf16>
    %158 = vector.shape_cast %157 : vector<1x32x256xbf16> to vector<32x256xbf16>
    %cst_73 = arith.constant dense<0.000000e+00> : vector<2x256xf32>
    %159 = tpu.matmul %155, %158, %cst_73 {dimension_numbers = #tpu.dot_dimension_numbers<[1], [0], [0], [1], [0, 0, 1, 1], [], []>} : vector<2x32xbf16>, vector<32x256xbf16>, vector<2x256xf32> -> vector<2x256xf32>
    %160 = arith.addf %154, %159 : vector<2x256xf32>
    %c0_74 = arith.constant 0 : index
    %c0_75 = arith.constant 0 : index
    %161 = vector.load %arg12[%c0_74, %c0_75] : memref<2x256xf32, #tpu.memory_space<vmem>>, vector<2x256xf32>
    tpu.vector_store %arg12[%c0_74, %c0_75], %160 {strides = array<i32>} : memref<2x256xf32, #tpu.memory_space<vmem>>, vector<2x256xf32>,
    %c3_i32 = arith.constant 3 : i32
    %c0_76 = arith.constant 0 : index
    %c0_77 = arith.constant 0 : index
    %162 = vector.load %arg11[%c0_76, %c0_77] : memref<2x32xf32, #tpu.memory_space<vmem>>, vector<2x32xf32>
    %163 = arith.truncf %162 : vector<2x32xf32> to vector<2x32xbf16>
    %cst_78 = arith.constant dense<0.000000e+00> : vector<2x32xf32>
    %164 = tpu.matmul %163, %4, %cst_78 {dimension_numbers = #tpu.dot_dimension_numbers<[1], [0], [0], [1], [0, 0, 1, 1], [], []>} : vector<2x32xbf16>, vector<32x32xbf16>, vector<2x32xf32> -> vector<2x32xf32>
    %165 = vector.broadcast %10 : vector<1x32xf32> to vector<2x32xf32>
    %166 = arith.addf %164, %165 : vector<2x32xf32>
    %cst_79 = arith.constant dense<0.000000e+00> : vector<2x32xf32>
    %167 = tpu.matmul %163, %6, %cst_79 {dimension_numbers = #tpu.dot_dimension_numbers<[1], [0], [0], [1], [0, 0, 1, 1], [], []>} : vector<2x32xbf16>, vector<32x32xbf16>, vector<2x32xf32> -> vector<2x32xf32>
    %168 = vector.broadcast %12 : vector<1x32xf32> to vector<2x32xf32>
    %169 = arith.addf %167, %168 : vector<2x32xf32>
    %cst_80 = arith.constant dense<0.000000e+00> : vector<2x32xf32>
    %170 = tpu.matmul %163, %8, %cst_80 {dimension_numbers = #tpu.dot_dimension_numbers<[1], [0], [0], [1], [0, 0, 1, 1], [], []>} : vector<2x32xbf16>, vector<32x32xbf16>, vector<2x32xf32> -> vector<2x32xf32>
    %171 = vector.broadcast %14 : vector<1x32xf32> to vector<2x32xf32>
    %172 = arith.addf %170, %171 : vector<2x32xf32>
    %173 = arith.index_cast %c3_i32 : i32 to index
    %c0_81 = arith.constant 0 : index
    %c0_82 = arith.constant 0 : index
    %c0_83 = arith.constant 0 : index
    %174 = vector.load %arg1[%173, %c0_81, %c0_82, %c0_83] : memref<8x3x2x32xf32, #tpu.memory_space<vmem>>, vector<1x3x2x32xf32>
    %175 = vector.shape_cast %174 : vector<1x3x2x32xf32> to vector<3x2x32xf32>
    %176 = vector.extract_strided_slice %175 {offsets = [0, 0, 0], sizes = [1, 2, 32], strides = [1, 1, 1]} : vector<3x2x32xf32> to vector<1x2x32xf32>
    %177 = vector.shape_cast %176 : vector<1x2x32xf32> to vector<2x32xf32>
    %178 = arith.addf %177, %166 : vector<2x32xf32>
    %179 = arith.negf %178 : vector<2x32xf32>
    %180 = math.exp %179 : vector<2x32xf32>
    %cst_84 = arith.constant 1.000000e+00 : f32
    %181 = vector.broadcast %cst_84 : f32 to vector<2x32xf32>
    %182 = arith.addf %181, %180 : vector<2x32xf32>
    %183 = arith.divf %181, %182 : vector<2x32xf32>
    %184 = vector.extract_strided_slice %175 {offsets = [1, 0, 0], sizes = [1, 2, 32], strides = [1, 1, 1]} : vector<3x2x32xf32> to vector<1x2x32xf32>
    %185 = vector.shape_cast %184 : vector<1x2x32xf32> to vector<2x32xf32>
    %186 = arith.addf %185, %169 : vector<2x32xf32>
    %187 = arith.negf %186 : vector<2x32xf32>
    %188 = math.exp %187 : vector<2x32xf32>
    %cst_85 = arith.constant 1.000000e+00 : f32
    %189 = vector.broadcast %cst_85 : f32 to vector<2x32xf32>
    %190 = arith.addf %189, %188 : vector<2x32xf32>
    %191 = arith.divf %189, %190 : vector<2x32xf32>
    %192 = vector.extract_strided_slice %175 {offsets = [2, 0, 0], sizes = [1, 2, 32], strides = [1, 1, 1]} : vector<3x2x32xf32> to vector<1x2x32xf32>
    %193 = vector.shape_cast %192 : vector<1x2x32xf32> to vector<2x32xf32>
    %194 = arith.mulf %183, %172 : vector<2x32xf32>
    %195 = arith.addf %193, %194 : vector<2x32xf32>
    %196 = math.tanh %195 : vector<2x32xf32>
    %cst_86 = arith.constant 1.000000e+00 : f32
    %197 = vector.broadcast %cst_86 : f32 to vector<2x32xf32>
    %198 = arith.subf %197, %191 : vector<2x32xf32>
    %199 = arith.mulf %198, %196 : vector<2x32xf32>
    %200 = arith.mulf %191, %162 : vector<2x32xf32>
    %201 = arith.addf %199, %200 : vector<2x32xf32>
    %c0_87 = arith.constant 0 : index
    %c0_88 = arith.constant 0 : index
    %202 = vector.load %arg11[%c0_87, %c0_88] : memref<2x32xf32, #tpu.memory_space<vmem>>, vector<2x32xf32>
    tpu.vector_store %arg11[%c0_87, %c0_88], %201 {strides = array<i32>} : memref<2x32xf32, #tpu.memory_space<vmem>>, vector<2x32xf32>,
    %c0_89 = arith.constant 0 : index
    %c0_90 = arith.constant 0 : index
    %203 = vector.load %arg12[%c0_89, %c0_90] : memref<2x256xf32, #tpu.memory_space<vmem>>, vector<2x256xf32>
    %204 = arith.truncf %201 : vector<2x32xf32> to vector<2x32xbf16>
    %205 = arith.index_cast %c3_i32 : i32 to index
    %c0_91 = arith.constant 0 : index
    %c0_92 = arith.constant 0 : index
    %206 = vector.load %arg4[%205, %c0_91, %c0_92] : memref<8x32x256xbf16, #tpu.memory_space<vmem>>, vector<1x32x256xbf16>
    %207 = vector.shape_cast %206 : vector<1x32x256xbf16> to vector<32x256xbf16>
    %cst_93 = arith.constant dense<0.000000e+00> : vector<2x256xf32>
    %208 = tpu.matmul %204, %207, %cst_93 {dimension_numbers = #tpu.dot_dimension_numbers<[1], [0], [0], [1], [0, 0, 1, 1], [], []>} : vector<2x32xbf16>, vector<32x256xbf16>, vector<2x256xf32> -> vector<2x256xf32>
    %209 = arith.addf %203, %208 : vector<2x256xf32>
    %c0_94 = arith.constant 0 : index
    %c0_95 = arith.constant 0 : index
    %210 = vector.load %arg12[%c0_94, %c0_95] : memref<2x256xf32, #tpu.memory_space<vmem>>, vector<2x256xf32>
    tpu.vector_store %arg12[%c0_94, %c0_95], %209 {strides = array<i32>} : memref<2x256xf32, #tpu.memory_space<vmem>>, vector<2x256xf32>,
    %c4_i32 = arith.constant 4 : i32
    %c0_96 = arith.constant 0 : index
    %c0_97 = arith.constant 0 : index
    %211 = vector.load %arg11[%c0_96, %c0_97] : memref<2x32xf32, #tpu.memory_space<vmem>>, vector<2x32xf32>
    %212 = arith.truncf %211 : vector<2x32xf32> to vector<2x32xbf16>
    %cst_98 = arith.constant dense<0.000000e+00> : vector<2x32xf32>
    %213 = tpu.matmul %212, %4, %cst_98 {dimension_numbers = #tpu.dot_dimension_numbers<[1], [0], [0], [1], [0, 0, 1, 1], [], []>} : vector<2x32xbf16>, vector<32x32xbf16>, vector<2x32xf32> -> vector<2x32xf32>
    %214 = vector.broadcast %10 : vector<1x32xf32> to vector<2x32xf32>
    %215 = arith.addf %213, %214 : vector<2x32xf32>
    %cst_99 = arith.constant dense<0.000000e+00> : vector<2x32xf32>
    %216 = tpu.matmul %212, %6, %cst_99 {dimension_numbers = #tpu.dot_dimension_numbers<[1], [0], [0], [1], [0, 0, 1, 1], [], []>} : vector<2x32xbf16>, vector<32x32xbf16>, vector<2x32xf32> -> vector<2x32xf32>
    %217 = vector.broadcast %12 : vector<1x32xf32> to vector<2x32xf32>
    %218 = arith.addf %216, %217 : vector<2x32xf32>
    %cst_100 = arith.constant dense<0.000000e+00> : vector<2x32xf32>
    %219 = tpu.matmul %212, %8, %cst_100 {dimension_numbers = #tpu.dot_dimension_numbers<[1], [0], [0], [1], [0, 0, 1, 1], [], []>} : vector<2x32xbf16>, vector<32x32xbf16>, vector<2x32xf32> -> vector<2x32xf32>
    %220 = vector.broadcast %14 : vector<1x32xf32> to vector<2x32xf32>
    %221 = arith.addf %219, %220 : vector<2x32xf32>
    %222 = arith.index_cast %c4_i32 : i32 to index
    %c0_101 = arith.constant 0 : index
    %c0_102 = arith.constant 0 : index
    %c0_103 = arith.constant 0 : index
    %223 = vector.load %arg1[%222, %c0_101, %c0_102, %c0_103] : memref<8x3x2x32xf32, #tpu.memory_space<vmem>>, vector<1x3x2x32xf32>
    %224 = vector.shape_cast %223 : vector<1x3x2x32xf32> to vector<3x2x32xf32>
    %225 = vector.extract_strided_slice %224 {offsets = [0, 0, 0], sizes = [1, 2, 32], strides = [1, 1, 1]} : vector<3x2x32xf32> to vector<1x2x32xf32>
    %226 = vector.shape_cast %225 : vector<1x2x32xf32> to vector<2x32xf32>
    %227 = arith.addf %226, %215 : vector<2x32xf32>
    %228 = arith.negf %227 : vector<2x32xf32>
    %229 = math.exp %228 : vector<2x32xf32>
    %cst_104 = arith.constant 1.000000e+00 : f32
    %230 = vector.broadcast %cst_104 : f32 to vector<2x32xf32>
    %231 = arith.addf %230, %229 : vector<2x32xf32>
    %232 = arith.divf %230, %231 : vector<2x32xf32>
    %233 = vector.extract_strided_slice %224 {offsets = [1, 0, 0], sizes = [1, 2, 32], strides = [1, 1, 1]} : vector<3x2x32xf32> to vector<1x2x32xf32>
    %234 = vector.shape_cast %233 : vector<1x2x32xf32> to vector<2x32xf32>
    %235 = arith.addf %234, %218 : vector<2x32xf32>
    %236 = arith.negf %235 : vector<2x32xf32>
    %237 = math.exp %236 : vector<2x32xf32>
    %cst_105 = arith.constant 1.000000e+00 : f32
    %238 = vector.broadcast %cst_105 : f32 to vector<2x32xf32>
    %239 = arith.addf %238, %237 : vector<2x32xf32>
    %240 = arith.divf %238, %239 : vector<2x32xf32>
    %241 = vector.extract_strided_slice %224 {offsets = [2, 0, 0], sizes = [1, 2, 32], strides = [1, 1, 1]} : vector<3x2x32xf32> to vector<1x2x32xf32>
    %242 = vector.shape_cast %241 : vector<1x2x32xf32> to vector<2x32xf32>
    %243 = arith.mulf %232, %221 : vector<2x32xf32>
    %244 = arith.addf %242, %243 : vector<2x32xf32>
    %245 = math.tanh %244 : vector<2x32xf32>
    %cst_106 = arith.constant 1.000000e+00 : f32
    %246 = vector.broadcast %cst_106 : f32 to vector<2x32xf32>
    %247 = arith.subf %246, %240 : vector<2x32xf32>
    %248 = arith.mulf %247, %245 : vector<2x32xf32>
    %249 = arith.mulf %240, %211 : vector<2x32xf32>
    %250 = arith.addf %248, %249 : vector<2x32xf32>
    %c0_107 = arith.constant 0 : index
    %c0_108 = arith.constant 0 : index
    %251 = vector.load %arg11[%c0_107, %c0_108] : memref<2x32xf32, #tpu.memory_space<vmem>>, vector<2x32xf32>
    tpu.vector_store %arg11[%c0_107, %c0_108], %250 {strides = array<i32>} : memref<2x32xf32, #tpu.memory_space<vmem>>, vector<2x32xf32>,
    %c0_109 = arith.constant 0 : index
    %c0_110 = arith.constant 0 : index
    %252 = vector.load %arg12[%c0_109, %c0_110] : memref<2x256xf32, #tpu.memory_space<vmem>>, vector<2x256xf32>
    %253 = arith.truncf %250 : vector<2x32xf32> to vector<2x32xbf16>
    %254 = arith.index_cast %c4_i32 : i32 to index
    %c0_111 = arith.constant 0 : index
    %c0_112 = arith.constant 0 : index
    %255 = vector.load %arg4[%254, %c0_111, %c0_112] : memref<8x32x256xbf16, #tpu.memory_space<vmem>>, vector<1x32x256xbf16>
    %256 = vector.shape_cast %255 : vector<1x32x256xbf16> to vector<32x256xbf16>
    %cst_113 = arith.constant dense<0.000000e+00> : vector<2x256xf32>
    %257 = tpu.matmul %253, %256, %cst_113 {dimension_numbers = #tpu.dot_dimension_numbers<[1], [0], [0], [1], [0, 0, 1, 1], [], []>} : vector<2x32xbf16>, vector<32x256xbf16>, vector<2x256xf32> -> vector<2x256xf32>
    %258 = arith.addf %252, %257 : vector<2x256xf32>
    %c0_114 = arith.constant 0 : index
    %c0_115 = arith.constant 0 : index
    %259 = vector.load %arg12[%c0_114, %c0_115] : memref<2x256xf32, #tpu.memory_space<vmem>>, vector<2x256xf32>
    tpu.vector_store %arg12[%c0_114, %c0_115], %258 {strides = array<i32>} : memref<2x256xf32, #tpu.memory_space<vmem>>, vector<2x256xf32>,
    %c5_i32 = arith.constant 5 : i32
    %c0_116 = arith.constant 0 : index
    %c0_117 = arith.constant 0 : index
    %260 = vector.load %arg11[%c0_116, %c0_117] : memref<2x32xf32, #tpu.memory_space<vmem>>, vector<2x32xf32>
    %261 = arith.truncf %260 : vector<2x32xf32> to vector<2x32xbf16>
    %cst_118 = arith.constant dense<0.000000e+00> : vector<2x32xf32>
    %262 = tpu.matmul %261, %4, %cst_118 {dimension_numbers = #tpu.dot_dimension_numbers<[1], [0], [0], [1], [0, 0, 1, 1], [], []>} : vector<2x32xbf16>, vector<32x32xbf16>, vector<2x32xf32> -> vector<2x32xf32>
    %263 = vector.broadcast %10 : vector<1x32xf32> to vector<2x32xf32>
    %264 = arith.addf %262, %263 : vector<2x32xf32>
    %cst_119 = arith.constant dense<0.000000e+00> : vector<2x32xf32>
    %265 = tpu.matmul %261, %6, %cst_119 {dimension_numbers = #tpu.dot_dimension_numbers<[1], [0], [0], [1], [0, 0, 1, 1], [], []>} : vector<2x32xbf16>, vector<32x32xbf16>, vector<2x32xf32> -> vector<2x32xf32>
    %266 = vector.broadcast %12 : vector<1x32xf32> to vector<2x32xf32>
    %267 = arith.addf %265, %266 : vector<2x32xf32>
    %cst_120 = arith.constant dense<0.000000e+00> : vector<2x32xf32>
    %268 = tpu.matmul %261, %8, %cst_120 {dimension_numbers = #tpu.dot_dimension_numbers<[1], [0], [0], [1], [0, 0, 1, 1], [], []>} : vector<2x32xbf16>, vector<32x32xbf16>, vector<2x32xf32> -> vector<2x32xf32>
    %269 = vector.broadcast %14 : vector<1x32xf32> to vector<2x32xf32>
    %270 = arith.addf %268, %269 : vector<2x32xf32>
    %271 = arith.index_cast %c5_i32 : i32 to index
    %c0_121 = arith.constant 0 : index
    %c0_122 = arith.constant 0 : index
    %c0_123 = arith.constant 0 : index
    %272 = vector.load %arg1[%271, %c0_121, %c0_122, %c0_123] : memref<8x3x2x32xf32, #tpu.memory_space<vmem>>, vector<1x3x2x32xf32>
    %273 = vector.shape_cast %272 : vector<1x3x2x32xf32> to vector<3x2x32xf32>
    %274 = vector.extract_strided_slice %273 {offsets = [0, 0, 0], sizes = [1, 2, 32], strides = [1, 1, 1]} : vector<3x2x32xf32> to vector<1x2x32xf32>
    %275 = vector.shape_cast %274 : vector<1x2x32xf32> to vector<2x32xf32>
    %276 = arith.addf %275, %264 : vector<2x32xf32>
    %277 = arith.negf %276 : vector<2x32xf32>
    %278 = math.exp %277 : vector<2x32xf32>
    %cst_124 = arith.constant 1.000000e+00 : f32
    %279 = vector.broadcast %cst_124 : f32 to vector<2x32xf32>
    %280 = arith.addf %279, %278 : vector<2x32xf32>
    %281 = arith.divf %279, %280 : vector<2x32xf32>
    %282 = vector.extract_strided_slice %273 {offsets = [1, 0, 0], sizes = [1, 2, 32], strides = [1, 1, 1]} : vector<3x2x32xf32> to vector<1x2x32xf32>
    %283 = vector.shape_cast %282 : vector<1x2x32xf32> to vector<2x32xf32>
    %284 = arith.addf %283, %267 : vector<2x32xf32>
    %285 = arith.negf %284 : vector<2x32xf32>
    %286 = math.exp %285 : vector<2x32xf32>
    %cst_125 = arith.constant 1.000000e+00 : f32
    %287 = vector.broadcast %cst_125 : f32 to vector<2x32xf32>
    %288 = arith.addf %287, %286 : vector<2x32xf32>
    %289 = arith.divf %287, %288 : vector<2x32xf32>
    %290 = vector.extract_strided_slice %273 {offsets = [2, 0, 0], sizes = [1, 2, 32], strides = [1, 1, 1]} : vector<3x2x32xf32> to vector<1x2x32xf32>
    %291 = vector.shape_cast %290 : vector<1x2x32xf32> to vector<2x32xf32>
    %292 = arith.mulf %281, %270 : vector<2x32xf32>
    %293 = arith.addf %291, %292 : vector<2x32xf32>
    %294 = math.tanh %293 : vector<2x32xf32>
    %cst_126 = arith.constant 1.000000e+00 : f32
    %295 = vector.broadcast %cst_126 : f32 to vector<2x32xf32>
    %296 = arith.subf %295, %289 : vector<2x32xf32>
    %297 = arith.mulf %296, %294 : vector<2x32xf32>
    %298 = arith.mulf %289, %260 : vector<2x32xf32>
    %299 = arith.addf %297, %298 : vector<2x32xf32>
    %c0_127 = arith.constant 0 : index
    %c0_128 = arith.constant 0 : index
    %300 = vector.load %arg11[%c0_127, %c0_128] : memref<2x32xf32, #tpu.memory_space<vmem>>, vector<2x32xf32>
    tpu.vector_store %arg11[%c0_127, %c0_128], %299 {strides = array<i32>} : memref<2x32xf32, #tpu.memory_space<vmem>>, vector<2x32xf32>,
    %c0_129 = arith.constant 0 : index
    %c0_130 = arith.constant 0 : index
    %301 = vector.load %arg12[%c0_129, %c0_130] : memref<2x256xf32, #tpu.memory_space<vmem>>, vector<2x256xf32>
    %302 = arith.truncf %299 : vector<2x32xf32> to vector<2x32xbf16>
    %303 = arith.index_cast %c5_i32 : i32 to index
    %c0_131 = arith.constant 0 : index
    %c0_132 = arith.constant 0 : index
    %304 = vector.load %arg4[%303, %c0_131, %c0_132] : memref<8x32x256xbf16, #tpu.memory_space<vmem>>, vector<1x32x256xbf16>
    %305 = vector.shape_cast %304 : vector<1x32x256xbf16> to vector<32x256xbf16>
    %cst_133 = arith.constant dense<0.000000e+00> : vector<2x256xf32>
    %306 = tpu.matmul %302, %305, %cst_133 {dimension_numbers = #tpu.dot_dimension_numbers<[1], [0], [0], [1], [0, 0, 1, 1], [], []>} : vector<2x32xbf16>, vector<32x256xbf16>, vector<2x256xf32> -> vector<2x256xf32>
    %307 = arith.addf %301, %306 : vector<2x256xf32>
    %c0_134 = arith.constant 0 : index
    %c0_135 = arith.constant 0 : index
    %308 = vector.load %arg12[%c0_134, %c0_135] : memref<2x256xf32, #tpu.memory_space<vmem>>, vector<2x256xf32>
    tpu.vector_store %arg12[%c0_134, %c0_135], %307 {strides = array<i32>} : memref<2x256xf32, #tpu.memory_space<vmem>>, vector<2x256xf32>,
    %c6_i32 = arith.constant 6 : i32
    %c0_136 = arith.constant 0 : index
    %c0_137 = arith.constant 0 : index
    %309 = vector.load %arg11[%c0_136, %c0_137] : memref<2x32xf32, #tpu.memory_space<vmem>>, vector<2x32xf32>
    %310 = arith.truncf %309 : vector<2x32xf32> to vector<2x32xbf16>
    %cst_138 = arith.constant dense<0.000000e+00> : vector<2x32xf32>
    %311 = tpu.matmul %310, %4, %cst_138 {dimension_numbers = #tpu.dot_dimension_numbers<[1], [0], [0], [1], [0, 0, 1, 1], [], []>} : vector<2x32xbf16>, vector<32x32xbf16>, vector<2x32xf32> -> vector<2x32xf32>
    %312 = vector.broadcast %10 : vector<1x32xf32> to vector<2x32xf32>
    %313 = arith.addf %311, %312 : vector<2x32xf32>
    %cst_139 = arith.constant dense<0.000000e+00> : vector<2x32xf32>
    %314 = tpu.matmul %310, %6, %cst_139 {dimension_numbers = #tpu.dot_dimension_numbers<[1], [0], [0], [1], [0, 0, 1, 1], [], []>} : vector<2x32xbf16>, vector<32x32xbf16>, vector<2x32xf32> -> vector<2x32xf32>
    %315 = vector.broadcast %12 : vector<1x32xf32> to vector<2x32xf32>
    %316 = arith.addf %314, %315 : vector<2x32xf32>
    %cst_140 = arith.constant dense<0.000000e+00> : vector<2x32xf32>
    %317 = tpu.matmul %310, %8, %cst_140 {dimension_numbers = #tpu.dot_dimension_numbers<[1], [0], [0], [1], [0, 0, 1, 1], [], []>} : vector<2x32xbf16>, vector<32x32xbf16>, vector<2x32xf32> -> vector<2x32xf32>
    %318 = vector.broadcast %14 : vector<1x32xf32> to vector<2x32xf32>
    %319 = arith.addf %317, %318 : vector<2x32xf32>
    %320 = arith.index_cast %c6_i32 : i32 to index
    %c0_141 = arith.constant 0 : index
    %c0_142 = arith.constant 0 : index
    %c0_143 = arith.constant 0 : index
    %321 = vector.load %arg1[%320, %c0_141, %c0_142, %c0_143] : memref<8x3x2x32xf32, #tpu.memory_space<vmem>>, vector<1x3x2x32xf32>
    %322 = vector.shape_cast %321 : vector<1x3x2x32xf32> to vector<3x2x32xf32>
    %323 = vector.extract_strided_slice %322 {offsets = [0, 0, 0], sizes = [1, 2, 32], strides = [1, 1, 1]} : vector<3x2x32xf32> to vector<1x2x32xf32>
    %324 = vector.shape_cast %323 : vector<1x2x32xf32> to vector<2x32xf32>
    %325 = arith.addf %324, %313 : vector<2x32xf32>
    %326 = arith.negf %325 : vector<2x32xf32>
    %327 = math.exp %326 : vector<2x32xf32>
    %cst_144 = arith.constant 1.000000e+00 : f32
    %328 = vector.broadcast %cst_144 : f32 to vector<2x32xf32>
    %329 = arith.addf %328, %327 : vector<2x32xf32>
    %330 = arith.divf %328, %329 : vector<2x32xf32>
    %331 = vector.extract_strided_slice %322 {offsets = [1, 0, 0], sizes = [1, 2, 32], strides = [1, 1, 1]} : vector<3x2x32xf32> to vector<1x2x32xf32>
    %332 = vector.shape_cast %331 : vector<1x2x32xf32> to vector<2x32xf32>
    %333 = arith.addf %332, %316 : vector<2x32xf32>
    %334 = arith.negf %333 : vector<2x32xf32>
    %335 = math.exp %334 : vector<2x32xf32>
    %cst_145 = arith.constant 1.000000e+00 : f32
    %336 = vector.broadcast %cst_145 : f32 to vector<2x32xf32>
    %337 = arith.addf %336, %335 : vector<2x32xf32>
    %338 = arith.divf %336, %337 : vector<2x32xf32>
    %339 = vector.extract_strided_slice %322 {offsets = [2, 0, 0], sizes = [1, 2, 32], strides = [1, 1, 1]} : vector<3x2x32xf32> to vector<1x2x32xf32>
    %340 = vector.shape_cast %339 : vector<1x2x32xf32> to vector<2x32xf32>
    %341 = arith.mulf %330, %319 : vector<2x32xf32>
    %342 = arith.addf %340, %341 : vector<2x32xf32>
    %343 = math.tanh %342 : vector<2x32xf32>
    %cst_146 = arith.constant 1.000000e+00 : f32
    %344 = vector.broadcast %cst_146 : f32 to vector<2x32xf32>
    %345 = arith.subf %344, %338 : vector<2x32xf32>
    %346 = arith.mulf %345, %343 : vector<2x32xf32>
    %347 = arith.mulf %338, %309 : vector<2x32xf32>
    %348 = arith.addf %346, %347 : vector<2x32xf32>
    %c0_147 = arith.constant 0 : index
    %c0_148 = arith.constant 0 : index
    %349 = vector.load %arg11[%c0_147, %c0_148] : memref<2x32xf32, #tpu.memory_space<vmem>>, vector<2x32xf32>
    tpu.vector_store %arg11[%c0_147, %c0_148], %348 {strides = array<i32>} : memref<2x32xf32, #tpu.memory_space<vmem>>, vector<2x32xf32>,
    %c0_149 = arith.constant 0 : index
    %c0_150 = arith.constant 0 : index
    %350 = vector.load %arg12[%c0_149, %c0_150] : memref<2x256xf32, #tpu.memory_space<vmem>>, vector<2x256xf32>
    %351 = arith.truncf %348 : vector<2x32xf32> to vector<2x32xbf16>
    %352 = arith.index_cast %c6_i32 : i32 to index
    %c0_151 = arith.constant 0 : index
    %c0_152 = arith.constant 0 : index
    %353 = vector.load %arg4[%352, %c0_151, %c0_152] : memref<8x32x256xbf16, #tpu.memory_space<vmem>>, vector<1x32x256xbf16>
    %354 = vector.shape_cast %353 : vector<1x32x256xbf16> to vector<32x256xbf16>
    %cst_153 = arith.constant dense<0.000000e+00> : vector<2x256xf32>
    %355 = tpu.matmul %351, %354, %cst_153 {dimension_numbers = #tpu.dot_dimension_numbers<[1], [0], [0], [1], [0, 0, 1, 1], [], []>} : vector<2x32xbf16>, vector<32x256xbf16>, vector<2x256xf32> -> vector<2x256xf32>
    %356 = arith.addf %350, %355 : vector<2x256xf32>
    %c0_154 = arith.constant 0 : index
    %c0_155 = arith.constant 0 : index
    %357 = vector.load %arg12[%c0_154, %c0_155] : memref<2x256xf32, #tpu.memory_space<vmem>>, vector<2x256xf32>
    tpu.vector_store %arg12[%c0_154, %c0_155], %356 {strides = array<i32>} : memref<2x256xf32, #tpu.memory_space<vmem>>, vector<2x256xf32>,
    %c7_i32 = arith.constant 7 : i32
    %c0_156 = arith.constant 0 : index
    %c0_157 = arith.constant 0 : index
    %358 = vector.load %arg11[%c0_156, %c0_157] : memref<2x32xf32, #tpu.memory_space<vmem>>, vector<2x32xf32>
    %359 = arith.truncf %358 : vector<2x32xf32> to vector<2x32xbf16>
    %cst_158 = arith.constant dense<0.000000e+00> : vector<2x32xf32>
    %360 = tpu.matmul %359, %4, %cst_158 {dimension_numbers = #tpu.dot_dimension_numbers<[1], [0], [0], [1], [0, 0, 1, 1], [], []>} : vector<2x32xbf16>, vector<32x32xbf16>, vector<2x32xf32> -> vector<2x32xf32>
    %361 = vector.broadcast %10 : vector<1x32xf32> to vector<2x32xf32>
    %362 = arith.addf %360, %361 : vector<2x32xf32>
    %cst_159 = arith.constant dense<0.000000e+00> : vector<2x32xf32>
    %363 = tpu.matmul %359, %6, %cst_159 {dimension_numbers = #tpu.dot_dimension_numbers<[1], [0], [0], [1], [0, 0, 1, 1], [], []>} : vector<2x32xbf16>, vector<32x32xbf16>, vector<2x32xf32> -> vector<2x32xf32>
    %364 = vector.broadcast %12 : vector<1x32xf32> to vector<2x32xf32>
    %365 = arith.addf %363, %364 : vector<2x32xf32>
    %cst_160 = arith.constant dense<0.000000e+00> : vector<2x32xf32>
    %366 = tpu.matmul %359, %8, %cst_160 {dimension_numbers = #tpu.dot_dimension_numbers<[1], [0], [0], [1], [0, 0, 1, 1], [], []>} : vector<2x32xbf16>, vector<32x32xbf16>, vector<2x32xf32> -> vector<2x32xf32>
    %367 = vector.broadcast %14 : vector<1x32xf32> to vector<2x32xf32>
    %368 = arith.addf %366, %367 : vector<2x32xf32>
    %369 = arith.index_cast %c7_i32 : i32 to index
    %c0_161 = arith.constant 0 : index
    %c0_162 = arith.constant 0 : index
    %c0_163 = arith.constant 0 : index
    %370 = vector.load %arg1[%369, %c0_161, %c0_162, %c0_163] : memref<8x3x2x32xf32, #tpu.memory_space<vmem>>, vector<1x3x2x32xf32>
    %371 = vector.shape_cast %370 : vector<1x3x2x32xf32> to vector<3x2x32xf32>
    %372 = vector.extract_strided_slice %371 {offsets = [0, 0, 0], sizes = [1, 2, 32], strides = [1, 1, 1]} : vector<3x2x32xf32> to vector<1x2x32xf32>
    %373 = vector.shape_cast %372 : vector<1x2x32xf32> to vector<2x32xf32>
    %374 = arith.addf %373, %362 : vector<2x32xf32>
    %375 = arith.negf %374 : vector<2x32xf32>
    %376 = math.exp %375 : vector<2x32xf32>
    %cst_164 = arith.constant 1.000000e+00 : f32
    %377 = vector.broadcast %cst_164 : f32 to vector<2x32xf32>
    %378 = arith.addf %377, %376 : vector<2x32xf32>
    %379 = arith.divf %377, %378 : vector<2x32xf32>
    %380 = vector.extract_strided_slice %371 {offsets = [1, 0, 0], sizes = [1, 2, 32], strides = [1, 1, 1]} : vector<3x2x32xf32> to vector<1x2x32xf32>
    %381 = vector.shape_cast %380 : vector<1x2x32xf32> to vector<2x32xf32>
    %382 = arith.addf %381, %365 : vector<2x32xf32>
    %383 = arith.negf %382 : vector<2x32xf32>
    %384 = math.exp %383 : vector<2x32xf32>
    %cst_165 = arith.constant 1.000000e+00 : f32
    %385 = vector.broadcast %cst_165 : f32 to vector<2x32xf32>
    %386 = arith.addf %385, %384 : vector<2x32xf32>
    %387 = arith.divf %385, %386 : vector<2x32xf32>
    %388 = vector.extract_strided_slice %371 {offsets = [2, 0, 0], sizes = [1, 2, 32], strides = [1, 1, 1]} : vector<3x2x32xf32> to vector<1x2x32xf32>
    %389 = vector.shape_cast %388 : vector<1x2x32xf32> to vector<2x32xf32>
    %390 = arith.mulf %379, %368 : vector<2x32xf32>
    %391 = arith.addf %389, %390 : vector<2x32xf32>
    %392 = math.tanh %391 : vector<2x32xf32>
    %cst_166 = arith.constant 1.000000e+00 : f32
    %393 = vector.broadcast %cst_166 : f32 to vector<2x32xf32>
    %394 = arith.subf %393, %387 : vector<2x32xf32>
    %395 = arith.mulf %394, %392 : vector<2x32xf32>
    %396 = arith.mulf %387, %358 : vector<2x32xf32>
    %397 = arith.addf %395, %396 : vector<2x32xf32>
    %c0_167 = arith.constant 0 : index
    %c0_168 = arith.constant 0 : index
    %398 = vector.load %arg11[%c0_167, %c0_168] : memref<2x32xf32, #tpu.memory_space<vmem>>, vector<2x32xf32>
    tpu.vector_store %arg11[%c0_167, %c0_168], %397 {strides = array<i32>} : memref<2x32xf32, #tpu.memory_space<vmem>>, vector<2x32xf32>,
    %c0_169 = arith.constant 0 : index
    %c0_170 = arith.constant 0 : index
    %399 = vector.load %arg12[%c0_169, %c0_170] : memref<2x256xf32, #tpu.memory_space<vmem>>, vector<2x256xf32>
    %400 = arith.truncf %397 : vector<2x32xf32> to vector<2x32xbf16>
    %401 = arith.index_cast %c7_i32 : i32 to index
    %c0_171 = arith.constant 0 : index
    %c0_172 = arith.constant 0 : index
    %402 = vector.load %arg4[%401, %c0_171, %c0_172] : memref<8x32x256xbf16, #tpu.memory_space<vmem>>, vector<1x32x256xbf16>
    %403 = vector.shape_cast %402 : vector<1x32x256xbf16> to vector<32x256xbf16>
    %cst_173 = arith.constant dense<0.000000e+00> : vector<2x256xf32>
    %404 = tpu.matmul %400, %403, %cst_173 {dimension_numbers = #tpu.dot_dimension_numbers<[1], [0], [0], [1], [0, 0, 1, 1], [], []>} : vector<2x32xbf16>, vector<32x256xbf16>, vector<2x256xf32> -> vector<2x256xf32>
    %405 = arith.addf %399, %404 : vector<2x256xf32>
    %c0_174 = arith.constant 0 : index
    %c0_175 = arith.constant 0 : index
    %406 = vector.load %arg12[%c0_174, %c0_175] : memref<2x256xf32, #tpu.memory_space<vmem>>, vector<2x256xf32>
    tpu.vector_store %arg12[%c0_174, %c0_175], %405 {strides = array<i32>} : memref<2x256xf32, #tpu.memory_space<vmem>>, vector<2x256xf32>,
    %c8_i32 = arith.constant 8 : i32
    %c1_i32_176 = arith.constant 1 : i32
    %407 = arith.cmpi eq, %arg0, %c1_i32_176 : i32
    %408 = arith.extui %407 : i1 to i32
    %c0_i32_177 = arith.constant 0 : i32
    %409 = arith.cmpi ne, %408, %c0_i32_177 : i32
    scf.if %409 {
      %c0_178 = arith.constant 0 : index
      %c0_179 = arith.constant 0 : index
      %410 = vector.load %arg12[%c0_178, %c0_179] : memref<2x256xf32, #tpu.memory_space<vmem>>, vector<2x256xf32>
      %c0_180 = arith.constant 0 : index
      %c0_181 = arith.constant 0 : index
      %411 = vector.load %arg5[%c0_180, %c0_181] : memref<1x256xf32, #tpu.memory_space<vmem>>, vector<1x256xf32>
      %412 = vector.broadcast %411 : vector<1x256xf32> to vector<2x256xf32>
      %413 = arith.addf %410, %412 : vector<2x256xf32>
      %cst_182 = arith.constant 0.000000e+00 : f32
      %414 = vector.broadcast %cst_182 : f32 to vector<2x256xf32>
      %415 = arith.maximumf %413, %414 : vector<2x256xf32>
      %416 = arith.truncf %415 : vector<2x256xf32> to vector<2x256xbf16>
      %c0_183 = arith.constant 0 : index
      %c0_184 = arith.constant 0 : index
      %417 = vector.load %arg6[%c0_183, %c0_184] : memref<256x128xbf16, #tpu.memory_space<vmem>>, vector<256x128xbf16>
      %cst_185 = arith.constant dense<0.000000e+00> : vector<2x128xf32>
      %418 = tpu.matmul %416, %417, %cst_185 {dimension_numbers = #tpu.dot_dimension_numbers<[1], [0], [0], [1], [0, 0, 1, 1], [], []>} : vector<2x256xbf16>, vector<256x128xbf16>, vector<2x128xf32> -> vector<2x128xf32>
      %c0_186 = arith.constant 0 : index
      %c0_187 = arith.constant 0 : index
      %419 = vector.load %arg7[%c0_186, %c0_187] : memref<1x128xf32, #tpu.memory_space<vmem>>, vector<1x128xf32>
      %420 = vector.broadcast %419 : vector<1x128xf32> to vector<2x128xf32>
      %421 = arith.addf %418, %420 : vector<2x128xf32>
      %cst_188 = arith.constant 0.000000e+00 : f32
      %422 = vector.broadcast %cst_188 : f32 to vector<2x128xf32>
      %423 = arith.maximumf %421, %422 : vector<2x128xf32>
      %424 = arith.truncf %423 : vector<2x128xf32> to vector<2x128xbf16>
      %c0_189 = arith.constant 0 : index
      %c0_190 = arith.constant 0 : index
      %425 = vector.load %arg8[%c0_189, %c0_190] : memref<128x6xbf16, #tpu.memory_space<vmem>>, vector<128x6xbf16>
      %cst_191 = arith.constant dense<0.000000e+00> : vector<2x6xf32>
      %426 = tpu.matmul %424, %425, %cst_191 {dimension_numbers = #tpu.dot_dimension_numbers<[1], [0], [0], [1], [0, 0, 1, 1], [], []>} : vector<2x128xbf16>, vector<128x6xbf16>, vector<2x6xf32> -> vector<2x6xf32>
      %c0_192 = arith.constant 0 : index
      %c0_193 = arith.constant 0 : index
      %427 = vector.load %arg9[%c0_192, %c0_193] : memref<1x6xf32, #tpu.memory_space<vmem>>, vector<1x6xf32>
      %428 = vector.broadcast %427 : vector<1x6xf32> to vector<2x6xf32>
      %429 = arith.addf %426, %428 : vector<2x6xf32>
      %c0_194 = arith.constant 0 : index
      %c0_195 = arith.constant 0 : index
      %430 = vector.load %arg10[%c0_194, %c0_195] : memref<2x6xf32, #tpu.memory_space<vmem>>, vector<2x6xf32>
      tpu.vector_store %arg10[%c0_194, %c0_195], %429 {strides = array<i32>} : memref<2x6xf32, #tpu.memory_space<vmem>>, vector<2x6xf32>,
    } else {
    }
    return
  }
  func.func @transform_0(%arg0: i32) -> (i32, i32, i32, i32) {
    %c0_i32 = arith.constant 0 : i32
    %c0_i32_0 = arith.constant 0 : i32
    %c0_i32_1 = arith.constant 0 : i32
    %c0_i32_2 = arith.constant 0 : i32
    return %arg0, %c0_i32, %c0_i32_0, %c0_i32_1 : i32, i32, i32, i32
  }
  func.func @transform_1(%arg0: i32) -> (i32, i32, i32) {
    %c0_i32 = arith.constant 0 : i32
    %c0_i32_0 = arith.constant 0 : i32
    %c0_i32_1 = arith.constant 0 : i32
    %c0_i32_2 = arith.constant 0 : i32
    return %c0_i32, %c0_i32_0, %c0_i32_1 : i32, i32, i32
  }
  func.func @transform_2(%arg0: i32) -> (i32, i32, i32) {
    %c0_i32 = arith.constant 0 : i32
    %c0_i32_0 = arith.constant 0 : i32
    %c0_i32_1 = arith.constant 0 : i32
    %c0_i32_2 = arith.constant 0 : i32
    return %c0_i32, %c0_i32_0, %c0_i32_1 : i32, i32, i32
  }
  func.func @transform_3(%arg0: i32) -> (i32, i32, i32) {
    %c0_i32 = arith.constant 0 : i32
    %c0_i32_0 = arith.constant 0 : i32
    %c0_i32_1 = arith.constant 0 : i32
    return %arg0, %c0_i32, %c0_i32_0 : i32, i32, i32
  }
  func.func @transform_4(%arg0: i32) -> (i32, i32) {
    %c0_i32 = arith.constant 0 : i32
    %c0_i32_0 = arith.constant 0 : i32
    %c0_i32_1 = arith.constant 0 : i32
    return %c0_i32, %c0_i32_0 : i32, i32
  }
  func.func @transform_5(%arg0: i32) -> (i32, i32) {
    %c0_i32 = arith.constant 0 : i32
    %c0_i32_0 = arith.constant 0 : i32
    %c0_i32_1 = arith.constant 0 : i32
    return %c0_i32, %c0_i32_0 : i32, i32
  }
  func.func @transform_6(%arg0: i32) -> (i32, i32) {
    %c0_i32 = arith.constant 0 : i32
    %c0_i32_0 = arith.constant 0 : i32
    %c0_i32_1 = arith.constant 0 : i32
    return %c0_i32, %c0_i32_0 : i32, i32
  }
  func.func @transform_7(%arg0: i32) -> (i32, i32) {
    %c0_i32 = arith.constant 0 : i32
    %c0_i32_0 = arith.constant 0 : i32
    %c0_i32_1 = arith.constant 0 : i32
    return %c0_i32, %c0_i32_0 : i32, i32
  }
  func.func @transform_8(%arg0: i32) -> (i32, i32) {
    %c0_i32 = arith.constant 0 : i32
    %c0_i32_0 = arith.constant 0 : i32
    %c0_i32_1 = arith.constant 0 : i32
    return %c0_i32, %c0_i32_0 : i32, i32
  }
  func.func @transform_9(%arg0: i32) -> (i32, i32) {
    %c0_i32 = arith.constant 0 : i32
    %c0_i32_0 = arith.constant 0 : i32
    %c0_i32_1 = arith.constant 0 : i32
    return %c0_i32, %c0_i32_0 : i32, i32
  }
}

</mosaic_0001>

<bundles_post_ra>
// kernel: classifier_forward.2
= control target key start
LH: loop header
LB: loop body
LE: loop exit
PB: predicated region body
PF: predicated region fallthrough
CT: control target
= control target key end

     0   :  { %s549_s12 = smov 0   ;;  %s656_s0 = inlined_call_operand.vmem [shape: bf16[2,4,16], index: 0, kind: input, shape index: {}]   ;;  %s657_s1 = inlined_call_operand.vmem [shape: bf16[96,4], index: 1, kind: input, shape index: {}]   ;;  %s658_s2 = inlined_call_operand.vmem [shape: f32[96,1], index: 2, kind: input, shape index: {}]   ;;  %s659_s3 = inlined_call_operand.vmem [shape: f32[2,96,16], index: 3, kind: output, shape index: {}]  }
   0x1 LB: > { %s456_s13 = sadd.s32 4294967295, %s526_s12   ;;  %p460_p0 = scmp.ge.s32.totalorder %s526_s12, 1  ;;  %s526_s12 = sphi %s549_s12, %s13_s12  }
   0x2   : > { %p136_p1 = scmp.lt.s32.totalorder %s526_s12, 3 }
   0x4   : > { %p137_p2 = pnand %p460_p0, %p136_p1 }
   0x5   : > { %p159_p3 = scmp.lt.s32.totalorder (!%p137_p2), %s456_s13, 1 }
   0x6   : > { %140 = sbr.rel (%p137_p2) target bundleno = 229 (0xe5), region = 32 }
   0xb   : > { %v514_v0 = vld [vmem:[%s657_s1] sm:$0xff]   ;;  %vm284_vm0 = vcmask 31744   ;;  %s661_s13 = smov (!%p159_p3, %s456_s13), 1  ;;  %v515_v1 = vld [vmem:[%s657_s1 + $0x10] sm:$0xff]   ;;  %vm303_vm1 = vcmask 1041408   ;;  %v528_v2 = vmov 0  }
   0xc   : > { %486 = vmatprep.mubr.msk.bf16.mxu0 %vm284_vm0, %v514_v0  ;;  %s461_s18 = sshll.u32 %s661_s13, 1  ;;  %490 = vmatprep.mubr.msk.bf16.mxu1 %vm284_vm0, %v515_v1  ;;  %v184_v4 = vld [vmem:[%s658_s2 + $0x10] sm:$0xff]  ;;  %v516_v6 = vld [vmem:[%s657_s1 + $0x8] sm:$0xff]   ;;  %v517_v7 = vld [vmem:[%s657_s1 + $0x18] sm:$0xff]   ;;  %s502_s29 = smul.u32 96, %s661_s13  ;;  %vm388_vm2 = vcmask 130048  }
   0xd   : > { %513 = vset.pattern.permute.xlu1 %v528_v2  ;;  %s162_s21 = scalar_lea.vmem %s656_s0, %s461_s18  ;;  %512 = vset.pattern.permute.xlu0 %v528_v2  ;;  %v182_v8 = vld [vmem:[%s658_s2] sm:$0xff]  ;;  %v185_v10 = vld [vmem:[%s658_s2 + $0x18] sm:$0xff]  ;;  %v183_v11 = vld [vmem:[%s658_s2 + $0x8] sm:$0xff] }
   0xe   : > { %v181_v3 = vld [vmem:[%s162_s21] sm:$0x3]  ;;  %206 = vperm.xlu1 %513, %v184_v4   ;;  %196 = vperm.xlu0 %512, %v182_v8   ;;  %v187_v12 = vld [vmem:[%s658_s2 + $0x28] sm:$0xff]  ;;  %v189_v15 = vld [vmem:[%s658_s2 + $0x38] sm:$0xff]  ;;  %s627_s5 = scalar_lea.vmem %s659_s3, %s502_s29 }
   0xf   : > { %500 = vmatprep.subr.msk.bf16.mxu0 %vm303_vm1, %v181_v3  ;;  %501 = vmatprep.subr.msk.bf16.mxu1 %vm303_vm1, %v181_v3  ;;  %v305_v5 = vsel %vm303_vm1, %v181_v3, 0  ;;  %v518_v9 = vld [vmem:[%s657_s1 + $0x20] sm:$0xff]   ;;  %v519_v14 = vld [vmem:[%s657_s1 + $0x28] sm:$0xff]   ;;  %v188_v16 = vld [vmem:[%s658_s2 + $0x30] sm:$0xff] }
  0x10   : > { %485 = vmatpush3.bf16.msra.mxu0 %v305_v5  ;;  %499 = vmatpush3.bf16.msra.mxu1 %v305_v5  ;;  %v186_v13 = vld [vmem:[%s658_s2 + $0x20] sm:$0xff]  ;;  %v191_v17 = vld [vmem:[%s658_s2 + $0x48] sm:$0xff]  ;;  %v193_v19 = vld [vmem:[%s658_s2 + $0x58] sm:$0xff] }
  0x11   : > { %v190_v18 = vld [vmem:[%s658_s2 + $0x40] sm:$0xff]  ;;  %v192_v20 = vld [vmem:[%s658_s2 + $0x50] sm:$0xff] }
  0x12   : > { %211 = vperm.xlu1 %513, %v185_v10   ;;  %201 = vperm.xlu0 %512, %v183_v11  }
  0x13   : > { %487 = vmatmul.mubr.msk.bf16.vlgmr.msra.gmra.mxu0 %vm284_vm0, %v516_v6  ;;  %491 = vmatmul.mubr.msk.bf16.vlgmr.msra.gmra.mxu1 %vm284_vm0, %v517_v7 }
  0x14   : > { %494 = vmatprep.mubr.msk.bf16.mxu1 %vm284_vm0, %v518_v9 }
  0x16   : > { %221 = vperm.xlu1 %513, %v187_v12   ;;  %216 = vperm.xlu0 %512, %v186_v13  }
  0x1a   : > { %231 = vperm.xlu1 %513, %v189_v15   ;;  %226 = vperm.xlu0 %512, %v188_v16  }
  0x1b   : > { %495 = vmatmul.mubr.msk.bf16.gmra.mxu1 %vm284_vm0, %v519_v14 }
  0x1e   : > { %241 = vperm.xlu1 %513, %v191_v17   ;;  %236 = vperm.xlu0 %512, %v190_v18  }
  0x22   : > { %251 = vperm.xlu1 %513, %v193_v19   ;;  %246 = vperm.xlu0 %512, %v192_v20  }
  0x89   : > { %v197_v21 = vpop.permute.xlu0 %196  ;;  %v207_v22 = vpop.permute.xlu1 %206 }
  0x8d   : > { %v202_v23 = vpop.permute.xlu0 %201  ;;  %v212_v24 = vpop.permute.xlu1 %211 }
  0x91   : > { %v217_v25 = vpop.permute.xlu0 %216  ;;  %v222_v26 = vpop.permute.xlu1 %221 }
  0x95   : > { %v227_v27 = vpop.permute.xlu0 %226  ;;  %v232_v28 = vpop.permute.xlu1 %231 }
  0x99   : > { %v237_v31 = vpop.permute.xlu0 %236  ;;  %v242_v40 = vpop.permute.xlu1 %241 }
  0x9d   : > { %v247_v47 = vpop.permute.xlu0 %246  ;;  %v252_v52 = vpop.permute.xlu1 %251 }
  0xd3   : > { %v488_v29 = vpop.f32.mrf.mxu0  ;;  %v492_v30 = vpop.f32.mrf.mxu1 }
  0xd4   : > { %v350_v32 = vadd.f32 %v488_v29, %v207_v22  ;;  %v366_v33 = vadd.f32 %v492_v30, %v227_v27 }
  0xd5   : > { %v341_v34 = vpop.f32.mrf.mxu0  ;;  %v357_v35 = vpop.f32.mrf.mxu1 }
  0xd6   : > { %391 = vst.msk [vmem:[%s627_s5 + $0x10] sm:$0xff] %vm388_vm2, %v350_v32  ;;  %395 = vst.msk [vmem:[%s627_s5 + $0x30] sm:$0xff] %vm388_vm2, %v366_v33  ;;  %v342_v36 = vadd.f32 %v341_v34, %v197_v21  ;;  %v358_v37 = vadd.f32 %v357_v35, %v217_v25 }
  0xd7   : > { %v489_v38 = vpop.f32.mrf.mxu0  ;;  %v493_v39 = vpop.f32.mrf.mxu1 }
  0xd8   : > { %389 = vst.msk [vmem:[%s627_s5] sm:$0xff] %vm388_vm2, %v342_v36  ;;  %393 = vst.msk [vmem:[%s627_s5 + $0x20] sm:$0xff] %vm388_vm2, %v358_v37  ;;  %v353_v41 = vadd.f32 %v489_v38, %v212_v24  ;;  %v369_v42 = vadd.f32 %v493_v39, %v232_v28 }
  0xd9   : > { %v344_v43 = vpop.f32.mrf.mxu0  ;;  %v360_v44 = vpop.f32.mrf.mxu1 }
  0xda   : > { %392 = vst.msk [vmem:[%s627_s5 + $0x18] sm:$0xff] %vm388_vm2, %v353_v41  ;;  %396 = vst.msk [vmem:[%s627_s5 + $0x38] sm:$0xff] %vm388_vm2, %v369_v42  ;;  %v345_v45 = vadd.f32 %v344_v43, %v202_v23  ;;  %v361_v46 = vadd.f32 %v360_v44, %v222_v26 }
  0xdb   : > { %v496_v48 = vpop.f32.mrf.mxu1 }
  0xdc   : > { %390 = vst.msk [vmem:[%s627_s5 + $0x8] sm:$0xff] %vm388_vm2, %v345_v45  ;;  %394 = vst.msk [vmem:[%s627_s5 + $0x28] sm:$0xff] %vm388_vm2, %v361_v46  ;;  %v382_v49 = vadd.f32 %v496_v48, %v247_v47 }
  0xdd   : > { %v373_v50 = vpop.f32.mrf.mxu1 }
  0xde   : > { %399 = vst.msk [vmem:[%s627_s5 + $0x50] sm:$0xff] %vm388_vm2, %v382_v49  ;;  %v374_v51 = vadd.f32 %v373_v50, %v237_v31 }
  0xdf   : > { %v497_v53 = vpop.f32.mrf.mxu1 }
  0xe0   : > { %397 = vst.msk [vmem:[%s627_s5 + $0x40] sm:$0xff] %vm388_vm2, %v374_v51  ;;  %v385_v54 = vadd.f32 %v497_v53, %v252_v52 }
  0xe1   : > { %v376_v55 = vpop.f32.mrf.mxu1 }
  0xe2   : > { %400 = vst.msk [vmem:[%s627_s5 + $0x58] sm:$0xff] %vm388_vm2, %v385_v54  ;;  %v377_v56 = vadd.f32 %v376_v55, %v242_v40 }
  0xe4   : > { %398 = vst.msk [vmem:[%s627_s5 + $0x48] sm:$0xff] %vm388_vm2, %v377_v56 }
  0xe5 PF: > { %s13_s12 = sadd.s32 1, %s526_s12  }
  0xe6   : > { %p10_p4 = scmp.ge.s32.totalorder %s13_s12, 4  }
  0xe8   :  { %12 = sbr.rel (!%p10_p4) target bundleno = 1 (0x1), region = 62 }

// kernel: classifier_forward.3
= control target key start
LH: loop header
LB: loop body
LE: loop exit
PB: predicated region body
PF: predicated region fallthrough
CT: control target
= control target key end

     0   :  { %14 = vsyncpa [#allocation5], 0  ;;  %s3486_s30 = smov 0   ;;  %s4018_s0 = inlined_call_operand.vmem [shape: f32[16,3,2,32], index: 0, kind: input, shape index: {}]   ;;  %s4019_s1 = inlined_call_operand.vmem [shape: bf16[3,32,32], index: 1, kind: input, shape index: {}]   ;;  %s4020_s2 = inlined_call_operand.vmem [shape: f32[3,1,32], index: 2, kind: input, shape index: {}]   ;;  %s4021_s3 = inlined_call_operand.vmem [shape: bf16[16,32,256], index: 3, kind: input, shape index: {}]   ;;  %s4022_s4 = inlined_call_operand.vmem [shape: f32[1,256], index: 4, kind: input, shape index: {}]   ;;  %s4023_s5 = inlined_call_operand.vmem [shape: bf16[256,128], index: 5, kind: input, shape index: {}]   ;;  %s4024_s6 = inlined_call_operand.vmem [shape: f32[1,128], index: 6, kind: input, shape index: {}]   ;;  %s4025_s7 = inlined_call_operand.vmem [shape: bf16[128,6], index: 7, kind: input, shape index: {}]   ;;  %s4026_s8 = inlined_call_operand.vmem [shape: f32[1,6], index: 8, kind: input, shape index: {}]   ;;  %s4027_s9 = inlined_call_operand.hbm [shape: f32[2,6], index: 9, kind: output, shape index: {}]  }
   0x1 LB: > { %s3492_s10 = sadd.s32 4294967295, %s3426_s30   ;;  %p2700_p0 = scmp.ge.s32.totalorder %s3426_s30, 1  ;;  %s3426_s30 = sphi %s3486_s30, %s20_s30  }
   0x2   : > { %p297_p1 = scmp.lt.s32.totalorder %s3426_s30, 3 }
   0x4   : > { %p298_p2 = pnand %p2700_p0, %p297_p1 }
   0x5   : > { %s2701_s11 = sshll.u32 (!%p298_p2), %s3492_s10, 3  ;;  %p2706_p4 = scmp.ne.s32.totalorder (!%p298_p2), %s3492_s10, 0 }
   0x6   : > { %301 = sbr.rel (%p298_p2) target bundleno = 2759 (0xac7), region = 56  ;;  %p336_p3 = scmp.lt.s32.totalorder (!%p298_p2), %s2701_s11, 15 }
   0xb   : > { %s4029_s11 = smov (!%p336_p3, %s2701_s11), 15  ;;  %353 = sbr.rel (%p2706_p4) target bundleno = 18 (0x12), region = 60 }
   0xc   : > { %s3202_s12 = smul.u32 6, %s4029_s11  ;;  %s2886_s13 = sshll.u32 %s4029_s11, 5 }
   0xd   : > { %s3500_s16 = scalar_lea.vmem %s4021_s3, %s2886_s13 }
   0xe   : > { %s3505_s19 = scalar_lea.vmem %s4018_s0, %s3202_s12 }
  0x10   : > { %vm354_vm0 = vcmask 254976   ;;  %v3428_v0 = vmov 0.0  }
  0x11   : > { %355 = vst.msk [vmem:[#allocation2] sm:$0x3] %vm354_vm0, %v3428_v0  ;;  %356 = vst [vmem:[#allocation3] sm:$0xf] %v3428_v0 }
  0x12 PF: > { %v3511_v1 = vld [vmem:[%s4019_s1 + $0x8] sm:$0xff]   ;;  %v3429_v2 = vmov 0.0   ;;  %v3517_v3 = vld [vmem:[%s4019_s1] sm:$0xff]   ;;  %vm3430_vm1 = vmmov 0   ;;  %v3528_v5 = vld [vmem:[%s4019_s1 + $0x18] sm:$0xff]   ;;  %vm396_vm2 = vcmask 261120   ;;  %v658_v62 = vlaneseq }
  0x13   : > { %2990 = vmatprep.subr.bf16.mxu0 %v3429_v2  ;;  %2998 = vmatprep.subr.bf16.mxu1 %v3429_v2  ;;  %v3537_v6 = vld [vmem:[%s4019_s1 + $0x10] sm:$0xff]   ;;  %v3546_v8 = vld [vmem:[%s4019_s1 + $0x28] sm:$0xff]   ;;  %v3553_v9 = vld [vmem:[%s4019_s1 + $0x20] sm:$0xff]   ;;  %v3431_v13 = vmov 0   ;;  %vm580_vm3 = vcmask 254976   ;;  %p2855_p5 = scmp.ne.s32.totalorder %s3492_s10, 1 }
  0x14   : > { %2991 = vmatpush3.bf16.msra.mxu0 %v3511_v1  ;;  %2994 = vmatprep.mubr.msk.bf16.mxu0 %vm3430_vm1, %v3429_v2  ;;  %v3231_v10 = vld [vmem:[%s3500_s16 + $0x10] ss:$8 sps:$4 sm:$0xff]   ;;  %v3233_v11 = vld [vmem:[%s3500_s16 + $0x14] ss:$8 sps:$4 sm:$0xff]   ;;  %v3236_v12 = vld [vmem:[%s3500_s16 + $0x4] ss:$8 sps:$4 sm:$0xff]  }
  0x15   : > { %2992 = vmatprep.subr.bf16.mxu0 %v3429_v2  ;;  %3002 = vmatprep.mubr.msk.bf16.mxu1 %vm3430_vm1, %v3429_v2  ;;  %v3234_v14 = vld [vmem:[%s3500_s16] ss:$8 sps:$4 sm:$0xff]   ;;  %v558_v44 = vld [vmem:[%s3505_s19 + $0x4] sm:$0x3]  ;;  %v3237_v56 = vld [vmem:[%s3500_s16 + $0x30] ss:$8 sps:$4 sm:$0xff]  }
  0x16   : > { %2999 = vmatpush3.bf16.msra.mxu1 %v3528_v5  ;;  %v3579_v15 = vld [vmem:[%s4020_s2] ss:$0 sm:$0xff]  ;;  %v3585_v18 = vld [vmem:[%s4020_s2 + $0x1] ss:$0 sm:$0xff]  ;;  %v557_v25 = vld [vmem:[%s3505_s19 + $0x2] sm:$0x3] }
  0x17   : > { %3000 = vmatprep.subr.bf16.mxu1 %v3429_v2  ;;  %v556_v17 = vld [vmem:[%s3505_s19] sm:$0x3]  ;;  %v3593_v40 = vld [vmem:[%s4020_s2 + $0x2] ss:$0 sm:$0xff]  ;;  %v3239_v57 = vld [vmem:[%s3500_s16 + $0x34] ss:$8 sps:$4 sm:$0xff]  }
  0x18   : > { %v3523_v4 = vld [vmem:[#allocation2] sm:$0x3]  ;;  %2993 = vmatpush3.bf16.msra.mxu0 %v3517_v3  ;;  %v3242_v58 = vld [vmem:[%s3500_s16 + $0x24] ss:$8 sps:$4 sm:$0xff]   ;;  %v3432_v60 = vmov 1983009808  }
  0x19   : > { %v377_v7 = vpack.c.bf16 %v3523_v4, %v3523_v4  ;;  %3006 = vmatprep.subr.bf16.mxu0 %v3429_v2  ;;  %v3240_v59 = vld [vmem:[%s3500_s16 + $0x20] ss:$8 sps:$4 sm:$0xff]   ;;  %v656_v61 = vunpack.c.l.s4 %v3432_v60  ;;  %v3630_v0 = vshrl.u32 %v658_v62, 7  ;;  %v3245_v60 = vld [vmem:[%s3500_s16 + $0x54] ss:$8 sps:$4 sm:$0xff]  }
  0x1a   : > { %3001 = vmatpush3.bf16.msra.mxu1 %v3537_v6  ;;  %v3246_v62 = vld [vmem:[%s3500_s16 + $0x40] ss:$8 sps:$4 sm:$0xff]  }
  0x1b   : > { %2995 = vmatmul.mubr.msk.bf16.vlgmr.msra.gmra.mxu0 %vm396_vm2, %v377_v7  ;;  %623 = vmatprep.subr.bf16.mxu1 %v3233_v11  ;;  %v657_v63 = vunpack.c.0.s8 %v656_v61  ;;  %v3248_v61 = vld [vmem:[%s3500_s16 + $0x44] ss:$8 sps:$4 sm:$0xff]  }
  0x1c   : > { %3007 = vmatpush3.bf16.msra.mxu0 %v3546_v8  ;;  %3010 = vmatprep.mubr.msk.bf16.mxu0 %vm3430_vm1, %v3429_v2 }
  0x1d   : > { %3003 = vmatmul.mubr.msk.bf16.vlgmr.msra.gmra.mxu1 %vm396_vm2, %v377_v7  ;;  %3008 = vmatprep.subr.bf16.mxu0 %v3429_v2 }
  0x1e   : > { %643 = vmatprep.mubr.bf16.mxu1 %v3431_v13  ;;  %624 = vmatpush1.bf16.msra.mxu1 %v3231_v10 }
  0x1f   : > { %625 = vmatprep.subr.bf16.mxu1 %v3236_v12  ;;  %v582_v12 = vld [vmem:[#allocation3] sm:$0xf] }
  0x20   : > { %3009 = vmatpush3.bf16.msra.mxu0 %v3553_v9 }
  0x21   : > { %3014 = vmatprep.subr.bf16.mxu0 %v3429_v2 }
  0x22   : > { %626 = vmatpush1.bf16.msra.mxu1 %v3234_v14 }
  0x23   : > { %3011 = vmatmul.mubr.msk.bf16.vlgmr.msra.gmra.mxu0 %vm396_vm2, %v377_v7  ;;  %3022 = vmatprep.subr.bf16.mxu1 %v3429_v2  ;;  %v3633_v7 = vsub.s32 %v657_v63, %v3630_v0 }
  0x24   : > { %3015 = vmatpush3.bf16.msra.mxu0 %v3511_v1  ;;  %3018 = vmatprep.mubr.msk.bf16.mxu0 %vm3430_vm1, %v3429_v2 }
  0x25   : > { %3016 = vmatprep.subr.bf16.mxu0 %v3429_v2 }
  0x28   : > { %3017 = vmatpush3.bf16.msra.mxu0 %v3517_v3 }
  0x29   : > { %3030 = vmatprep.subr.bf16.mxu0 %v3429_v2 }
  0xdb   : > { %v434_v16 = vpop.f32.mrf.mxu0 }
  0xdc   : > { %v435_v19 = vadd.f32 %v3579_v15, %v434_v16 }
  0xdd   : > { %v2996_v20 = vpop.f32.mrf.mxu0  ;;  %v492_v21 = vpop.f32.mrf.mxu1 }
  0xde   : > { %v559_v22 = vadd.f32 %v556_v17, %v435_v19  ;;  %v493_v23 = vadd.f32 %v3585_v18, %v492_v21  ;;  %v2739_v21 = vld [vmem:[%s3505_s19 + $0x6] sm:$0x3] }
  0xdf   : > { %v437_v24 = vpop.f32.mrf.mxu0  ;;  %v3004_v26 = vpop.f32.mrf.mxu1 }
  0xe0   : > { %v2729_v27 = vmul.f32 -1.442695, %v559_v22  ;;  %v566_v30 = vadd.f32 %v557_v25, %v493_v23 }
  0xe1   : > { %v2997_v28 = vpop.f32.mrf.mxu0  ;;  %v495_v29 = vpop.f32.mrf.mxu1 }
  0xe2   : > { %3279 = vpow2.f32 %v2729_v27  ;;  %v2730_v34 = vmul.f32 -1.442695, %v566_v30 }
  0xe3   : > { %v3005_v31 = vpop.f32.mrf.mxu1  ;;  %v550_v32 = vpop.f32.mrf.mxu0 }
  0xe4   : > { %3281 = vpow2.f32 %v2730_v34  ;;  %v551_v42 = vadd.f32 %v3593_v40, %v550_v32  ;;  %v2740_v31 = vld [vmem:[%s3505_s19 + $0x8] sm:$0x3] }
  0xe5   : > { %v3012_v33 = vpop.f32.mrf.mxu0 }
  0xe7   : > { %v553_v35 = vpop.f32.mrf.mxu0 }
  0xe9   : > { %v3013_v36 = vpop.f32.mrf.mxu0 }
  0xef   : > { %v3280_v37 = vpop.eup %3279 }
  0xf0   : > { %v563_v38 = vadd.f32 1.0, %v3280_v37 }
  0xf1   : > { %v3282_v39 = vpop.eup %3281 }
  0xf2   : > { %3283 = vrcp.f32 %v563_v38  ;;  %v570_v41 = vadd.f32 1.0, %v3282_v39 }
  0xf4   : > { %3285 = vrcp.f32 %v570_v41 }
  0xff   : > { %v3284_v43 = vpop.eup %3283 }
 0x100   : > { %v573_v45 = vmul.f32 %v3284_v43, %v551_v42 }
 0x101   : > { %v3286_v47 = vpop.eup %3285 }
 0x102   : > { %v574_v46 = vadd.f32 %v573_v45, %v558_v44  ;;  %v576_v48 = vsub.f32 1.0, %v3286_v47  ;;  %v578_v51 = vmul.f32 %v3286_v47, %v3523_v4  ;;  %v2741_v47 = vld [vmem:[%s3505_s19 + $0xa] sm:$0x3] }
 0x104   : > { %3287 = vtanh.f32 %v574_v46 }
 0x111   : > { %v3288_v49 = vpop.eup %3287 }
 0x112   : > { %v577_v50 = vmul.f32 %v3288_v49, %v576_v48 }
 0x114   : > { %v579_v52 = vadd.f32 %v578_v51, %v577_v50 }
 0x116   : > { %581 = vst.msk [vmem:[#allocation2] sm:$0x3] %vm580_vm3, %v579_v52  ;;  %v583_v53 = vpack.c.bf16 %v579_v52, %v579_v52 }
 0x118   : > { %2735 = vmatmul.mubr.msk.bf16.vlgmr.msra.gmra.mxu1 %vm396_vm2, %v583_v53 }
 0x119   : > { %3023 = vmatpush3.bf16.msra.mxu1 %v3528_v5  ;;  %3026 = vmatprep.mubr.msk.bf16.mxu1 %vm3430_vm1, %v3429_v2 }
 0x11a   : > { %3024 = vmatprep.subr.bf16.mxu1 %v3429_v2 }
 0x11d   : > { %3025 = vmatpush3.bf16.msra.mxu1 %v3537_v6  ;;  %v3605_v54 = vld [vmem:[#allocation2] sm:$0x3] }
 0x11e   : > { %v666_v55 = vpack.c.bf16 %v3605_v54, %v3605_v54  ;;  %858 = vmatprep.subr.bf16.mxu1 %v3239_v57 }
 0x120   : > { %3019 = vmatmul.mubr.msk.bf16.vlgmr.msra.gmra.mxu0 %vm396_vm2, %v666_v55  ;;  %3027 = vmatmul.mubr.msk.bf16.vlgmr.msra.gmra.mxu1 %vm396_vm2, %v666_v55 }
 0x121   : > { %3031 = vmatpush3.bf16.msra.mxu0 %v3546_v8  ;;  %3034 = vmatprep.mubr.msk.bf16.mxu0 %vm3430_vm1, %v3429_v2 }
 0x122   : > { %3032 = vmatprep.subr.bf16.mxu0 %v3429_v2  ;;  %878 = vmatprep.mubr.bf16.mxu1 %v3431_v13 }
 0x123   : > { %859 = vmatpush1.bf16.msra.mxu1 %v3237_v56 }
 0x124   : > { %860 = vmatprep.subr.bf16.mxu1 %v3242_v58 }
 0x125   : > { %3033 = vmatpush3.bf16.msra.mxu0 %v3553_v9 }
 0x126   : > { %3038 = vmatprep.subr.bf16.mxu0 %v3429_v2 }
 0x127   : > { %861 = vmatpush1.bf16.msra.mxu1 %v3240_v59  ;;  %v3243_v59 = vld [vmem:[%s3500_s16 + $0x50] ss:$8 sps:$4 sm:$0xff]  }
 0x128   : > { %3035 = vmatmul.mubr.msk.bf16.vlgmr.msra.gmra.mxu0 %vm396_vm2, %v666_v55  ;;  %3046 = vmatprep.subr.bf16.mxu1 %v3429_v2 }
 0x129   : > { %3039 = vmatpush3.bf16.msra.mxu0 %v3511_v1  ;;  %3042 = vmatprep.mubr.msk.bf16.mxu0 %vm3430_vm1, %v3429_v2 }
 0x12a   : > { %3040 = vmatprep.subr.bf16.mxu0 %v3429_v2 }
 0x12d   : > { %3041 = vmatpush3.bf16.msra.mxu0 %v3517_v3 }
 0x12e   : > { %3054 = vmatprep.subr.bf16.mxu0 %v3429_v2 }
 0x1d8   : > { %v645_v4 = vpop.f32.mrf.mxu1 }
 0x1da   : > { %v647_v10 = vpop.f32.mrf.mxu1 }
 0x1db   : > { %v654_v11 = vcombine.low %v645_v4, %v647_v10 }
 0x1dc   : > { %v649_v14 = vpop.f32.mrf.mxu1 }
 0x1dd   : > { %v661_v16 = vrot.slane %v654_v11, %v3633_v7 }
 0x1de   : > { %v650_v17 = vpop.f32.mrf.mxu1 }
 0x1df   : > { %v663_v19 = vadd.f32 %v661_v16, %v582_v12 }
 0x1e0   : > { %v704_v20 = vpop.f32.mrf.mxu0  ;;  %v744_v22 = vpop.f32.mrf.mxu1 }
 0x1e1   : > { %664 = vst [vmem:[#allocation3] sm:$0xf] %v663_v19  ;;  %v705_v23 = vadd.f32 %v3579_v15, %v704_v20  ;;  %v745_v30 = vadd.f32 %v3585_v18, %v744_v22  ;;  %v2756_v20 = vld [vmem:[%s3505_s19 + $0xc] sm:$0x3] }
 0x1e2   : > { %v3020_v24 = vpop.f32.mrf.mxu0  ;;  %v3028_v25 = vpop.f32.mrf.mxu1 }
 0x1e3   : > { %v794_v26 = vadd.f32 %v2739_v21, %v705_v23  ;;  %v801_v35 = vadd.f32 %v2740_v31, %v745_v30  ;;  %v2757_v30 = vld [vmem:[%s3505_s19 + $0xe] sm:$0x3] }
 0x1e4   : > { %v707_v27 = vpop.f32.mrf.mxu0  ;;  %v747_v28 = vpop.f32.mrf.mxu1 }
 0x1e5   : > { %v2742_v29 = vmul.f32 -1.442695, %v794_v26  ;;  %v2743_v38 = vmul.f32 -1.442695, %v801_v35 }
 0x1e6   : > { %v3021_v32 = vpop.f32.mrf.mxu0  ;;  %v3029_v33 = vpop.f32.mrf.mxu1 }
 0x1e7   : > { %3289 = vpow2.f32 %v2742_v29 }
 0x1e8   : > { %v784_v34 = vpop.f32.mrf.mxu0  ;;  %3291 = vpow2.f32 %v2743_v38  ;;  %v816_v14 = vld [vmem:[#allocation3] sm:$0xf] }
 0x1e9   : > { %v785_v45 = vadd.f32 %v3593_v40, %v784_v34 }
 0x1ea   : > { %v3036_v36 = vpop.f32.mrf.mxu0 }
 0x1ec   : > { %v787_v37 = vpop.f32.mrf.mxu0 }
 0x1ee   : > { %v3037_v39 = vpop.f32.mrf.mxu0 }
 0x1f4   : > { %v3290_v41 = vpop.eup %3289 }
 0x1f5   : > { %v798_v42 = vadd.f32 1.0, %v3290_v41  ;;  %v3292_v43 = vpop.eup %3291 }
 0x1f6   : > { %v805_v44 = vadd.f32 1.0, %v3292_v43 }
 0x1f7   : > { %3293 = vrcp.f32 %v798_v42 }
 0x1f8   : > { %3295 = vrcp.f32 %v805_v44 }
 0x204   : > { %v3294_v46 = vpop.eup %3293 }
 0x205   : > { %v808_v48 = vmul.f32 %v3294_v46, %v785_v45  ;;  %v3296_v50 = vpop.eup %3295  ;;  %v2758_v46 = vld [vmem:[%s3505_s19 + $0x10] sm:$0x3] }
 0x206   : > { %v811_v51 = vsub.f32 1.0, %v3296_v50  ;;  %v813_v55 = vmul.f32 %v3296_v50, %v3605_v54 }
 0x207   : > { %v809_v49 = vadd.f32 %v2741_v47, %v808_v48 }
 0x209   : > { %3297 = vtanh.f32 %v809_v49 }
 0x216   : > { %v3298_v52 = vpop.eup %3297 }
 0x217   : > { %v812_v53 = vmul.f32 %v3298_v52, %v811_v51 }
 0x219   : > { %v814_v56 = vadd.f32 %v813_v55, %v812_v53 }
 0x21b   : > { %815 = vst.msk [vmem:[#allocation2] sm:$0x3] %vm580_vm3, %v814_v56  ;;  %v817_v57 = vpack.c.bf16 %v814_v56, %v814_v56 }
 0x21d   : > { %2752 = vmatmul.mubr.msk.bf16.vlgmr.msra.gmra.mxu1 %vm396_vm2, %v817_v57 }
 0x21e   : > { %3047 = vmatpush3.bf16.msra.mxu1 %v3528_v5  ;;  %3050 = vmatprep.mubr.msk.bf16.mxu1 %vm3430_vm1, %v3429_v2 }
 0x21f   : > { %3048 = vmatprep.subr.bf16.mxu1 %v3429_v2 }
 0x222   : > { %3049 = vmatpush3.bf16.msra.mxu1 %v3537_v6  ;;  %v3650_v58 = vld [vmem:[#allocation2] sm:$0x3] }
 0x223   : > { %v901_v54 = vpack.c.bf16 %v3650_v58, %v3650_v58  ;;  %1093 = vmatprep.subr.bf16.mxu1 %v3245_v60  ;;  %v3254_v60 = vld [vmem:[%s3500_s16 + $0x64] ss:$8 sps:$4 sm:$0xff]  }
 0x225   : > { %3043 = vmatmul.mubr.msk.bf16.vlgmr.msra.gmra.mxu0 %vm396_vm2, %v901_v54  ;;  %3051 = vmatmul.mubr.msk.bf16.vlgmr.msra.gmra.mxu1 %vm396_vm2, %v901_v54 }
 0x226   : > { %3055 = vmatpush3.bf16.msra.mxu0 %v3546_v8  ;;  %3058 = vmatprep.mubr.msk.bf16.mxu0 %vm3430_vm1, %v3429_v2 }
 0x227   : > { %3056 = vmatprep.subr.bf16.mxu0 %v3429_v2  ;;  %1113 = vmatprep.mubr.bf16.mxu1 %v3431_v13 }
 0x228   : > { %1094 = vmatpush1.bf16.msra.mxu1 %v3243_v59  ;;  %v3251_v59 = vld [vmem:[%s3500_s16 + $0x74] ss:$8 sps:$4 sm:$0xff]  }
 0x229   : > { %1095 = vmatprep.subr.bf16.mxu1 %v3248_v61  ;;  %v3252_v61 = vld [vmem:[%s3500_s16 + $0x60] ss:$8 sps:$4 sm:$0xff]  }
 0x22a   : > { %3057 = vmatpush3.bf16.msra.mxu0 %v3553_v9 }
 0x22b   : > { %3062 = vmatprep.subr.bf16.mxu0 %v3429_v2 }
 0x22c   : > { %1096 = vmatpush1.bf16.msra.mxu1 %v3246_v62 }
 0x22d   : > { %3059 = vmatmul.mubr.msk.bf16.vlgmr.msra.gmra.mxu0 %vm396_vm2, %v901_v54  ;;  %3070 = vmatprep.subr.bf16.mxu1 %v3429_v2  ;;  %v3249_v54 = vld [vmem:[%s3500_s16 + $0x70] ss:$8 sps:$4 sm:$0xff]  }
 0x22e   : > { %3063 = vmatpush3.bf16.msra.mxu0 %v3511_v1  ;;  %3066 = vmatprep.mubr.msk.bf16.mxu0 %vm3430_vm1, %v3429_v2 }
 0x22f   : > { %3064 = vmatprep.subr.bf16.mxu0 %v3429_v2 }
 0x232   : > { %3065 = vmatpush3.bf16.msra.mxu0 %v3517_v3 }
 0x233   : > { %3078 = vmatprep.subr.bf16.mxu0 %v3429_v2 }
 0x2dd   : > { %v880_v63 = vpop.f32.mrf.mxu1 }
 0x2df   : > { %v882_v4 = vpop.f32.mrf.mxu1 }
 0x2e0   : > { %v889_v10 = vcombine.low %v880_v63, %v882_v4 }
 0x2e1   : > { %v884_v11 = vpop.f32.mrf.mxu1 }
 0x2e2   : > { %v896_v12 = vrot.slane %v889_v10, %v3633_v7 }
 0x2e3   : > { %v885_v16 = vpop.f32.mrf.mxu1 }
 0x2e4   : > { %v898_v17 = vadd.f32 %v896_v12, %v816_v14 }
 0x2e5   : > { %v939_v19 = vpop.f32.mrf.mxu0  ;;  %v979_v21 = vpop.f32.mrf.mxu1 }
 0x2e6   : > { %899 = vst [vmem:[#allocation3] sm:$0xf] %v898_v17  ;;  %v940_v22 = vadd.f32 %v3579_v15, %v939_v19  ;;  %v980_v29 = vadd.f32 %v3585_v18, %v979_v21  ;;  %v2773_v19 = vld [vmem:[%s3505_s19 + $0x12] sm:$0x3] }
 0x2e7   : > { %v3044_v23 = vpop.f32.mrf.mxu0  ;;  %v3052_v24 = vpop.f32.mrf.mxu1 }
 0x2e8   : > { %v1029_v25 = vadd.f32 %v2756_v20, %v940_v22  ;;  %v1036_v34 = vadd.f32 %v2757_v30, %v980_v29  ;;  %v2774_v29 = vld [vmem:[%s3505_s19 + $0x14] sm:$0x3] }
 0x2e9   : > { %v942_v26 = vpop.f32.mrf.mxu0  ;;  %v982_v27 = vpop.f32.mrf.mxu1 }
 0x2ea   : > { %v2759_v28 = vmul.f32 -1.442695, %v1029_v25  ;;  %v2760_v37 = vmul.f32 -1.442695, %v1036_v34 }
 0x2eb   : > { %v3045_v31 = vpop.f32.mrf.mxu0  ;;  %v3053_v32 = vpop.f32.mrf.mxu1 }
 0x2ec   : > { %3299 = vpow2.f32 %v2759_v28 }
 0x2ed   : > { %v1019_v33 = vpop.f32.mrf.mxu0  ;;  %3301 = vpow2.f32 %v2760_v37  ;;  %v1051_v12 = vld [vmem:[#allocation3] sm:$0xf] }
 0x2ee   : > { %v1020_v44 = vadd.f32 %v3593_v40, %v1019_v33 }
 0x2ef   : > { %v3060_v35 = vpop.f32.mrf.mxu0 }
 0x2f1   : > { %v1022_v36 = vpop.f32.mrf.mxu0 }
 0x2f3   : > { %v3061_v38 = vpop.f32.mrf.mxu0 }
 0x2f9   : > { %v3300_v39 = vpop.eup %3299 }
 0x2fa   : > { %v1033_v41 = vadd.f32 1.0, %v3300_v39  ;;  %v3302_v42 = vpop.eup %3301 }
 0x2fb   : > { %v1040_v43 = vadd.f32 1.0, %v3302_v42 }
 0x2fc   : > { %3303 = vrcp.f32 %v1033_v41 }
 0x2fd   : > { %3305 = vrcp.f32 %v1040_v43 }
 0x309   : > { %v3304_v45 = vpop.eup %3303 }
 0x30a   : > { %v1043_v47 = vmul.f32 %v3304_v45, %v1020_v44  ;;  %v3306_v49 = vpop.eup %3305  ;;  %v2775_v45 = vld [vmem:[%s3505_s19 + $0x16] sm:$0x3] }
 0x30b   : > { %v1046_v50 = vsub.f32 1.0, %v3306_v49  ;;  %v1048_v53 = vmul.f32 %v3306_v49, %v3650_v58 }
 0x30c   : > { %v1044_v48 = vadd.f32 %v2758_v46, %v1043_v47 }
 0x30e   : > { %3307 = vtanh.f32 %v1044_v48 }
 0x31b   : > { %v3308_v51 = vpop.eup %3307 }
 0x31c   : > { %v1047_v52 = vmul.f32 %v3308_v51, %v1046_v50 }
 0x31e   : > { %v1049_v55 = vadd.f32 %v1048_v53, %v1047_v52 }
 0x320   : > { %1050 = vst.msk [vmem:[#allocation2] sm:$0x3] %vm580_vm3, %v1049_v55  ;;  %v1052_v56 = vpack.c.bf16 %v1049_v55, %v1049_v55 }
 0x322   : > { %2769 = vmatmul.mubr.msk.bf16.vlgmr.msra.gmra.mxu1 %vm396_vm2, %v1052_v56 }
 0x323   : > { %3071 = vmatpush3.bf16.msra.mxu1 %v3528_v5  ;;  %3074 = vmatprep.mubr.msk.bf16.mxu1 %vm3430_vm1, %v3429_v2 }
 0x324   : > { %3072 = vmatprep.subr.bf16.mxu1 %v3429_v2 }
 0x327   : > { %3073 = vmatpush3.bf16.msra.mxu1 %v3537_v6  ;;  %v3690_v57 = vld [vmem:[#allocation2] sm:$0x3] }
 0x328   : > { %v1136_v58 = vpack.c.bf16 %v3690_v57, %v3690_v57  ;;  %1328 = vmatprep.subr.bf16.mxu1 %v3251_v59  ;;  %v3260_v59 = vld [vmem:[%s3500_s16 + $0x84] ss:$8 sps:$4 sm:$0xff]  }
 0x32a   : > { %3067 = vmatmul.mubr.msk.bf16.vlgmr.msra.gmra.mxu0 %vm396_vm2, %v1136_v58  ;;  %3075 = vmatmul.mubr.msk.bf16.vlgmr.msra.gmra.mxu1 %vm396_vm2, %v1136_v58 }
 0x32b   : > { %3079 = vmatpush3.bf16.msra.mxu0 %v3546_v8  ;;  %3082 = vmatprep.mubr.msk.bf16.mxu0 %vm3430_vm1, %v3429_v2 }
 0x32c   : > { %3080 = vmatprep.subr.bf16.mxu0 %v3429_v2  ;;  %1348 = vmatprep.mubr.bf16.mxu1 %v3431_v13 }
 0x32d   : > { %1329 = vmatpush1.bf16.msra.mxu1 %v3249_v54  ;;  %v3257_v54 = vld [vmem:[%s3500_s16 + $0x94] ss:$8 sps:$4 sm:$0xff]  }
 0x32e   : > { %1330 = vmatprep.subr.bf16.mxu1 %v3254_v60  ;;  %v3258_v60 = vld [vmem:[%s3500_s16 + $0x80] ss:$8 sps:$4 sm:$0xff]  }
 0x32f   : > { %3081 = vmatpush3.bf16.msra.mxu0 %v3553_v9 }
 0x330   : > { %3086 = vmatprep.subr.bf16.mxu0 %v3429_v2 }
 0x331   : > { %1331 = vmatpush1.bf16.msra.mxu1 %v3252_v61 }
 0x332   : > { %3083 = vmatmul.mubr.msk.bf16.vlgmr.msra.gmra.mxu0 %vm396_vm2, %v1136_v58  ;;  %3094 = vmatprep.subr.bf16.mxu1 %v3429_v2  ;;  %v3255_v58 = vld [vmem:[%s3500_s16 + $0x90] ss:$8 sps:$4 sm:$0xff]  }
 0x333   : > { %3087 = vmatpush3.bf16.msra.mxu0 %v3511_v1  ;;  %3090 = vmatprep.mubr.msk.bf16.mxu0 %vm3430_vm1, %v3429_v2 }
 0x334   : > { %3088 = vmatprep.subr.bf16.mxu0 %v3429_v2 }
 0x337   : > { %3089 = vmatpush3.bf16.msra.mxu0 %v3517_v3 }
 0x338   : > { %3102 = vmatprep.subr.bf16.mxu0 %v3429_v2 }
 0x3e2   : > { %v1115_v62 = vpop.f32.mrf.mxu1 }
 0x3e4   : > { %v1117_v63 = vpop.f32.mrf.mxu1 }
 0x3e5   : > { %v1124_v4 = vcombine.low %v1115_v62, %v1117_v63 }
 0x3e6   : > { %v1119_v10 = vpop.f32.mrf.mxu1 }
 0x3e7   : > { %v1131_v11 = vrot.slane %v1124_v4, %v3633_v7 }
 0x3e8   : > { %v1120_v14 = vpop.f32.mrf.mxu1 }
 0x3e9   : > { %v1133_v16 = vadd.f32 %v1131_v11, %v1051_v12 }
 0x3ea   : > { %v1174_v17 = vpop.f32.mrf.mxu0  ;;  %v1214_v20 = vpop.f32.mrf.mxu1 }
 0x3eb   : > { %1134 = vst [vmem:[#allocation3] sm:$0xf] %v1133_v16  ;;  %v1175_v21 = vadd.f32 %v3579_v15, %v1174_v17  ;;  %v1215_v28 = vadd.f32 %v3585_v18, %v1214_v20  ;;  %v2790_v17 = vld [vmem:[%s3505_s19 + $0x18] sm:$0x3] }
 0x3ec   : > { %v3068_v22 = vpop.f32.mrf.mxu0  ;;  %v3076_v23 = vpop.f32.mrf.mxu1 }
 0x3ed   : > { %v1264_v24 = vadd.f32 %v2773_v19, %v1175_v21  ;;  %v1271_v33 = vadd.f32 %v2774_v29, %v1215_v28  ;;  %v2791_v28 = vld [vmem:[%s3505_s19 + $0x1a] sm:$0x3] }
 0x3ee   : > { %v1177_v25 = vpop.f32.mrf.mxu0  ;;  %v1217_v26 = vpop.f32.mrf.mxu1 }
 0x3ef   : > { %v2776_v27 = vmul.f32 -1.442695, %v1264_v24  ;;  %v2777_v36 = vmul.f32 -1.442695, %v1271_v33 }
 0x3f0   : > { %v3069_v30 = vpop.f32.mrf.mxu0  ;;  %v3077_v31 = vpop.f32.mrf.mxu1 }
 0x3f1   : > { %3309 = vpow2.f32 %v2776_v27 }
 0x3f2   : > { %v1254_v32 = vpop.f32.mrf.mxu0  ;;  %3311 = vpow2.f32 %v2777_v36  ;;  %v1286_v11 = vld [vmem:[#allocation3] sm:$0xf] }
 0x3f3   : > { %v1255_v43 = vadd.f32 %v3593_v40, %v1254_v32 }
 0x3f4   : > { %v3084_v34 = vpop.f32.mrf.mxu0 }
 0x3f6   : > { %v1257_v35 = vpop.f32.mrf.mxu0 }
 0x3f8   : > { %v3085_v37 = vpop.f32.mrf.mxu0 }
 0x3fe   : > { %v3310_v38 = vpop.eup %3309 }
 0x3ff   : > { %v1268_v39 = vadd.f32 1.0, %v3310_v38  ;;  %v3312_v41 = vpop.eup %3311 }
 0x400   : > { %v1275_v42 = vadd.f32 1.0, %v3312_v41 }
 0x401   : > { %3313 = vrcp.f32 %v1268_v39 }
 0x402   : > { %3315 = vrcp.f32 %v1275_v42 }
 0x40e   : > { %v3314_v44 = vpop.eup %3313 }
 0x40f   : > { %v1278_v46 = vmul.f32 %v3314_v44, %v1255_v43  ;;  %v3316_v48 = vpop.eup %3315  ;;  %v2792_v44 = vld [vmem:[%s3505_s19 + $0x1c] sm:$0x3] }
 0x410   : > { %v1281_v49 = vsub.f32 1.0, %v3316_v48  ;;  %v1283_v52 = vmul.f32 %v3316_v48, %v3690_v57 }
 0x411   : > { %v1279_v47 = vadd.f32 %v2775_v45, %v1278_v46 }
 0x413   : > { %3317 = vtanh.f32 %v1279_v47 }
 0x420   : > { %v3318_v50 = vpop.eup %3317 }
 0x421   : > { %v1282_v51 = vmul.f32 %v3318_v50, %v1281_v49 }
 0x423   : > { %v1284_v53 = vadd.f32 %v1283_v52, %v1282_v51 }
 0x425   : > { %1285 = vst.msk [vmem:[#allocation2] sm:$0x3] %vm580_vm3, %v1284_v53  ;;  %v1287_v55 = vpack.c.bf16 %v1284_v53, %v1284_v53 }
 0x427   : > { %2786 = vmatmul.mubr.msk.bf16.vlgmr.msra.gmra.mxu1 %vm396_vm2, %v1287_v55 }
 0x428   : > { %3095 = vmatpush3.bf16.msra.mxu1 %v3528_v5  ;;  %3098 = vmatprep.mubr.msk.bf16.mxu1 %vm3430_vm1, %v3429_v2 }
 0x429   : > { %3096 = vmatprep.subr.bf16.mxu1 %v3429_v2 }
 0x42c   : > { %3097 = vmatpush3.bf16.msra.mxu1 %v3537_v6  ;;  %v3730_v56 = vld [vmem:[#allocation2] sm:$0x3] }
 0x42d   : > { %v1371_v57 = vpack.c.bf16 %v3730_v56, %v3730_v56  ;;  %1563 = vmatprep.subr.bf16.mxu1 %v3257_v54 }
 0x42f   : > { %3091 = vmatmul.mubr.msk.bf16.vlgmr.msra.gmra.mxu0 %vm396_vm2, %v1371_v57  ;;  %3099 = vmatmul.mubr.msk.bf16.vlgmr.msra.gmra.mxu1 %vm396_vm2, %v1371_v57 }
 0x430   : > { %3103 = vmatpush3.bf16.msra.mxu0 %v3546_v8  ;;  %3106 = vmatprep.mubr.msk.bf16.mxu0 %vm3430_vm1, %v3429_v2 }
 0x431   : > { %3104 = vmatprep.subr.bf16.mxu0 %v3429_v2  ;;  %1583 = vmatprep.mubr.bf16.mxu1 %v3431_v13 }
 0x432   : > { %1564 = vmatpush1.bf16.msra.mxu1 %v3255_v58 }
 0x433   : > { %1565 = vmatprep.subr.bf16.mxu1 %v3260_v59 }
 0x434   : > { %3105 = vmatpush3.bf16.msra.mxu0 %v3553_v9 }
 0x435   : > { %3110 = vmatprep.subr.bf16.mxu0 %v3429_v2 }
 0x436   : > { %1566 = vmatpush1.bf16.msra.mxu1 %v3258_v60 }
 0x437   : > { %3107 = vmatmul.mubr.msk.bf16.vlgmr.msra.gmra.mxu0 %vm396_vm2, %v1371_v57  ;;  %3118 = vmatprep.subr.bf16.mxu1 %v3429_v2 }
 0x438   : > { %3111 = vmatpush3.bf16.msra.mxu0 %v3511_v1  ;;  %3114 = vmatprep.mubr.msk.bf16.mxu0 %vm3430_vm1, %v3429_v2 }
 0x439   : > { %3112 = vmatprep.subr.bf16.mxu0 %v3429_v2 }
 0x43c   : > { %3113 = vmatpush3.bf16.msra.mxu0 %v3517_v3 }
 0x43d   : > { %3126 = vmatprep.subr.bf16.mxu0 %v3429_v2 }
 0x4e7   : > { %v1350_v61 = vpop.f32.mrf.mxu1 }
 0x4e9   : > { %v1352_v62 = vpop.f32.mrf.mxu1 }
 0x4ea   : > { %v1359_v63 = vcombine.low %v1350_v61, %v1352_v62 }
 0x4eb   : > { %v1354_v4 = vpop.f32.mrf.mxu1 }
 0x4ec   : > { %v1366_v10 = vrot.slane %v1359_v63, %v3633_v7  ;;  %v2807_v63 = vld [vmem:[%s3505_s19 + $0x1e] sm:$0x3] }
 0x4ed   : > { %v1355_v12 = vpop.f32.mrf.mxu1 }
 0x4ee   : > { %v1368_v14 = vadd.f32 %v1366_v10, %v1286_v11 }
 0x4ef   : > { %v1409_v16 = vpop.f32.mrf.mxu0  ;;  %v1449_v19 = vpop.f32.mrf.mxu1 }
 0x4f0   : > { %1369 = vst [vmem:[#allocation3] sm:$0xf] %v1368_v14  ;;  %v1410_v20 = vadd.f32 %v3579_v15, %v1409_v16  ;;  %v1450_v27 = vadd.f32 %v3585_v18, %v1449_v19 }
 0x4f1   : > { %v3092_v21 = vpop.f32.mrf.mxu0  ;;  %v3100_v22 = vpop.f32.mrf.mxu1 }
 0x4f2   : > { %v1499_v23 = vadd.f32 %v2790_v17, %v1410_v20  ;;  %v1506_v32 = vadd.f32 %v2791_v28, %v1450_v27  ;;  %v2808_v21 = vld [vmem:[%s3505_s19 + $0x20] sm:$0x3] }
 0x4f3   : > { %v1412_v24 = vpop.f32.mrf.mxu0  ;;  %v1452_v25 = vpop.f32.mrf.mxu1 }
 0x4f4   : > { %v2793_v26 = vmul.f32 -1.442695, %v1499_v23  ;;  %v2794_v35 = vmul.f32 -1.442695, %v1506_v32 }
 0x4f5   : > { %v3093_v29 = vpop.f32.mrf.mxu0  ;;  %v3101_v30 = vpop.f32.mrf.mxu1 }
 0x4f6   : > { %3319 = vpow2.f32 %v2793_v26 }
 0x4f7   : > { %v1489_v31 = vpop.f32.mrf.mxu0  ;;  %3321 = vpow2.f32 %v2794_v35 }
 0x4f8   : > { %v1490_v42 = vadd.f32 %v3593_v40, %v1489_v31 }
 0x4f9   : > { %v3108_v33 = vpop.f32.mrf.mxu0 }
 0x4fb   : > { %v1492_v34 = vpop.f32.mrf.mxu0 }
 0x4fd   : > { %v3109_v36 = vpop.f32.mrf.mxu0 }
 0x4fe   : > { %v2809_v36 = vld [vmem:[%s3505_s19 + $0x22] sm:$0x3] }
 0x503   : > { %v3320_v37 = vpop.eup %3319 }
 0x504   : > { %v1503_v38 = vadd.f32 1.0, %v3320_v37  ;;  %v3322_v39 = vpop.eup %3321 }
 0x505   : > { %v1510_v41 = vadd.f32 1.0, %v3322_v39 }
 0x506   : > { %3323 = vrcp.f32 %v1503_v38 }
 0x507   : > { %3325 = vrcp.f32 %v1510_v41 }
 0x513   : > { %v3324_v43 = vpop.eup %3323 }
 0x514   : > { %v1513_v45 = vmul.f32 %v3324_v43, %v1490_v42  ;;  %v3326_v47 = vpop.eup %3325 }
 0x515   : > { %v1516_v48 = vsub.f32 1.0, %v3326_v47  ;;  %v1518_v51 = vmul.f32 %v3326_v47, %v3730_v56  ;;  %v3808_v47 = vld [vmem:[%s4019_s1 + $0x18] sm:$0xff]  }
 0x516   : > { %v1514_v46 = vadd.f32 %v2792_v44, %v1513_v45 }
 0x518   : > { %3327 = vtanh.f32 %v1514_v46 }
 0x525   : > { %v3328_v49 = vpop.eup %3327 }
 0x526   : > { %v1517_v50 = vmul.f32 %v3328_v49, %v1516_v48  ;;  %v3817_v48 = vld [vmem:[%s4019_s1 + $0x10] sm:$0xff]  }
 0x528   : > { %v1519_v52 = vadd.f32 %v1518_v51, %v1517_v50  ;;  %v3829_v51 = vld [vmem:[%s4019_s1 + $0x28] sm:$0xff]  }
 0x52a   : > { %1520 = vst.msk [vmem:[#allocation2] sm:$0x3] %vm580_vm3, %v1519_v52  ;;  %v1522_v53 = vpack.c.bf16 %v1519_v52, %v1519_v52  ;;  %v3839_v52 = vld [vmem:[%s4019_s1 + $0x20] sm:$0xff]  }
 0x52c   : > { %2803 = vmatmul.mubr.msk.bf16.vlgmr.msra.gmra.mxu1 %vm396_vm2, %v1522_v53  ;;  %v3363_v53 = vld [vmem:[%s4019_s1 + $0x8] sm:$0xff]  }
 0x52d   : > { %3119 = vmatpush3.bf16.msra.mxu1 %v3528_v5  ;;  %3122 = vmatprep.mubr.msk.bf16.mxu1 %vm3430_vm1, %v3429_v2  ;;  %v3261_v5 = vld [vmem:[%s3500_s16 + $0xb0] ss:$8 sps:$4 sm:$0xff]  }
 0x52e   : > { %3120 = vmatprep.subr.bf16.mxu1 %v3429_v2 }
 0x531   : > { %3121 = vmatpush3.bf16.msra.mxu1 %v3537_v6  ;;  %v3770_v55 = vld [vmem:[#allocation2] sm:$0x3]  ;;  %v3263_v6 = vld [vmem:[%s3500_s16 + $0xb4] ss:$8 sps:$4 sm:$0xff]  }
 0x532   : > { %v1606_v56 = vpack.c.bf16 %v3770_v55, %v3770_v55  ;;  %1798 = vmatprep.subr.bf16.mxu1 %v3263_v6  ;;  %v3272_v6 = vld [vmem:[%s3500_s16 + $0xc4] ss:$8 sps:$4 sm:$0xff]  }
 0x534   : > { %3115 = vmatmul.mubr.msk.bf16.vlgmr.msra.gmra.mxu0 %vm396_vm2, %v1606_v56  ;;  %3123 = vmatmul.mubr.msk.bf16.vlgmr.msra.gmra.mxu1 %vm396_vm2, %v1606_v56 }
 0x535   : > { %3127 = vmatpush3.bf16.msra.mxu0 %v3546_v8  ;;  %3130 = vmatprep.mubr.msk.bf16.mxu0 %vm3430_vm1, %v3429_v2  ;;  %v3266_v8 = vld [vmem:[%s3500_s16 + $0xa4] ss:$8 sps:$4 sm:$0xff]  }
 0x536   : > { %3128 = vmatprep.subr.bf16.mxu0 %v3429_v2  ;;  %1818 = vmatprep.mubr.bf16.mxu1 %v3431_v13 }
 0x537   : > { %1799 = vmatpush1.bf16.msra.mxu1 %v3261_v5  ;;  %v3269_v5 = vld [vmem:[%s3500_s16 + $0xd4] ss:$8 sps:$4 sm:$0xff]  }
 0x538   : > { %1800 = vmatprep.subr.bf16.mxu1 %v3266_v8  ;;  %v3270_v8 = vld [vmem:[%s3500_s16 + $0xc0] ss:$8 sps:$4 sm:$0xff]  }
 0x539   : > { %3129 = vmatpush3.bf16.msra.mxu0 %v3553_v9  ;;  %v3264_v9 = vld [vmem:[%s3500_s16 + $0xa0] ss:$8 sps:$4 sm:$0xff]  }
 0x53a   : > { %3134 = vmatprep.subr.bf16.mxu0 %v3429_v2 }
 0x53b   : > { %1801 = vmatpush1.bf16.msra.mxu1 %v3264_v9 }
 0x53c   : > { %3131 = vmatmul.mubr.msk.bf16.vlgmr.msra.gmra.mxu0 %vm396_vm2, %v1606_v56  ;;  %3142 = vmatprep.subr.bf16.mxu1 %v3429_v2  ;;  %v3267_v56 = vld [vmem:[%s3500_s16 + $0xd0] ss:$8 sps:$4 sm:$0xff]  }
 0x53d   : > { %3135 = vmatpush3.bf16.msra.mxu0 %v3511_v1  ;;  %3138 = vmatprep.mubr.msk.bf16.mxu0 %vm3430_vm1, %v3429_v2 }
 0x53e   : > { %3136 = vmatprep.subr.bf16.mxu0 %v3429_v2 }
 0x541   : > { %3137 = vmatpush3.bf16.msra.mxu0 %v3517_v3  ;;  %v1521_v3 = vld [vmem:[#allocation3] sm:$0xf] }
 0x542   : > { %3150 = vmatprep.subr.bf16.mxu0 %v3429_v2 }
 0x5ec   : > { %v1585_v1 = vpop.f32.mrf.mxu1 }
 0x5ee   : > { %v1587_v57 = vpop.f32.mrf.mxu1 }
 0x5ef   : > { %v1594_v58 = vcombine.low %v1585_v1, %v1587_v57 }
 0x5f0   : > { %v1589_v54 = vpop.f32.mrf.mxu1 }
 0x5f1   : > { %v1601_v59 = vrot.slane %v1594_v58, %v3633_v7 }
 0x5f2   : > { %v1590_v60 = vpop.f32.mrf.mxu1 }
 0x5f3   : > { %v1603_v61 = vadd.f32 %v1601_v59, %v1521_v3 }
 0x5f4   : > { %v1644_v62 = vpop.f32.mrf.mxu0  ;;  %v1684_v4 = vpop.f32.mrf.mxu1 }
 0x5f5   : > { %1604 = vst [vmem:[#allocation3] sm:$0xf] %v1603_v61  ;;  %v1645_v10 = vadd.f32 %v3579_v15, %v1644_v62  ;;  %v1685_v20 = vadd.f32 %v3585_v18, %v1684_v4  ;;  %v2824_v62 = vld [vmem:[%s3505_s19 + $0x24] sm:$0x3] }
 0x5f6   : > { %v3116_v11 = vpop.f32.mrf.mxu0  ;;  %v3124_v12 = vpop.f32.mrf.mxu1 }
 0x5f7   : > { %v1734_v14 = vadd.f32 %v2807_v63, %v1645_v10  ;;  %v1741_v25 = vadd.f32 %v2808_v21, %v1685_v20  ;;  %v2825_v20 = vld [vmem:[%s3505_s19 + $0x26] sm:$0x3] }
 0x5f8   : > { %v1647_v16 = vpop.f32.mrf.mxu0  ;;  %v1687_v17 = vpop.f32.mrf.mxu1 }
 0x5f9   : > { %v2810_v19 = vmul.f32 -1.442695, %v1734_v14  ;;  %v2811_v28 = vmul.f32 -1.442695, %v1741_v25 }
 0x5fa   : > { %v3117_v22 = vpop.f32.mrf.mxu0  ;;  %v3125_v23 = vpop.f32.mrf.mxu1 }
 0x5fb   : > { %3329 = vpow2.f32 %v2810_v19 }
 0x5fc   : > { %v1724_v24 = vpop.f32.mrf.mxu0  ;;  %3331 = vpow2.f32 %v2811_v28  ;;  %v1756_v59 = vld [vmem:[#allocation3] sm:$0xf] }
 0x5fd   : > { %v1725_v34 = vadd.f32 %v3593_v40, %v1724_v24 }
 0x5fe   : > { %v3132_v26 = vpop.f32.mrf.mxu0 }
 0x600   : > { %v1727_v27 = vpop.f32.mrf.mxu0 }
 0x602   : > { %v3133_v29 = vpop.f32.mrf.mxu0 }
 0x608   : > { %v3330_v30 = vpop.eup %3329 }
 0x609   : > { %v1738_v31 = vadd.f32 1.0, %v3330_v30  ;;  %v3332_v32 = vpop.eup %3331 }
 0x60a   : > { %v1745_v33 = vadd.f32 1.0, %v3332_v32 }
 0x60b   : > { %3333 = vrcp.f32 %v1738_v31 }
 0x60c   : > { %3335 = vrcp.f32 %v1745_v33  ;;  %v2826_v33 = vld [vmem:[%s3505_s19 + $0x28] sm:$0x3] }
 0x618   : > { %v3334_v35 = vpop.eup %3333 }
 0x619   : > { %v1748_v37 = vmul.f32 %v3334_v35, %v1725_v34  ;;  %v3336_v39 = vpop.eup %3335 }
 0x61a   : > { %v1751_v41 = vsub.f32 1.0, %v3336_v39  ;;  %v1753_v44 = vmul.f32 %v3336_v39, %v3770_v55  ;;  %v3364_v55 = vld [vmem:[%s4019_s1] sm:$0xff]  }
 0x61b   : > { %v1749_v38 = vadd.f32 %v2809_v36, %v1748_v37 }
 0x61d   : > { %3337 = vtanh.f32 %v1749_v38 }
 0x62a   : > { %v3338_v42 = vpop.eup %3337 }
 0x62b   : > { %v1752_v43 = vmul.f32 %v3338_v42, %v1751_v41 }
 0x62d   : > { %v1754_v45 = vadd.f32 %v1753_v44, %v1752_v43 }
 0x62f   : > { %v1757_v46 = vpack.c.bf16 %v1754_v45, %v1754_v45  ;;  %1755 = vst.msk [vmem:[#allocation2] sm:$0x3] %vm580_vm3, %v1754_v45  ;;  %v3273_v45 = vld [vmem:[%s3500_s16 + $0xf0] ss:$8 sps:$4 sm:$0xff]  }
 0x631   : > { %2820 = vmatmul.mubr.msk.bf16.vlgmr.msra.gmra.mxu1 %vm396_vm2, %v1757_v46  ;;  %v3275_v46 = vld [vmem:[%s3500_s16 + $0xf4] ss:$8 sps:$4 sm:$0xff]  }
 0x632   : > { %3143 = vmatpush3.bf16.msra.mxu1 %v3808_v47  ;;  %3146 = vmatprep.mubr.msk.bf16.mxu1 %vm3430_vm1, %v3429_v2 }
 0x633   : > { %3144 = vmatprep.subr.bf16.mxu1 %v3429_v2 }
 0x636   : > { %3145 = vmatpush3.bf16.msra.mxu1 %v3817_v48  ;;  %v3820_v49 = vld [vmem:[#allocation2] sm:$0x3] }
 0x637   : > { %v1841_v50 = vpack.c.bf16 %v3820_v49, %v3820_v49  ;;  %2033 = vmatprep.subr.bf16.mxu1 %v3269_v5  ;;  %v2841_v5 = vld [vmem:[%s3505_s19 + $0x2a] sm:$0x3] }
 0x639   : > { %3139 = vmatmul.mubr.msk.bf16.vlgmr.msra.gmra.mxu0 %vm396_vm2, %v1841_v50  ;;  %3147 = vmatmul.mubr.msk.bf16.vlgmr.msra.gmra.mxu1 %vm396_vm2, %v1841_v50 }
 0x63a   : > { %3151 = vmatpush3.bf16.msra.mxu0 %v3829_v51  ;;  %3154 = vmatprep.mubr.msk.bf16.mxu0 %vm3430_vm1, %v3429_v2 }
 0x63b   : > { %3152 = vmatprep.subr.bf16.mxu0 %v3429_v2  ;;  %2053 = vmatprep.mubr.bf16.mxu1 %v3431_v13 }
 0x63c   : > { %2034 = vmatpush1.bf16.msra.mxu1 %v3267_v56 }
 0x63d   : > { %2035 = vmatprep.subr.bf16.mxu1 %v3272_v6 }
 0x63e   : > { %3153 = vmatpush3.bf16.msra.mxu0 %v3839_v52 }
 0x63f   : > { %3158 = vmatprep.subr.bf16.mxu0 %v3429_v2 }
 0x640   : > { %2036 = vmatpush1.bf16.msra.mxu1 %v3270_v8  ;;  %v3365_v8 = vld [vmem:[%s4020_s2] ss:$0 sm:$0xff] }
 0x641   : > { %3155 = vmatmul.mubr.msk.bf16.vlgmr.msra.gmra.mxu0 %vm396_vm2, %v1841_v50  ;;  %3166 = vmatprep.subr.bf16.mxu1 %v3429_v2 }
 0x642   : > { %3159 = vmatpush3.bf16.msra.mxu0 %v3363_v53  ;;  %3162 = vmatprep.mubr.msk.bf16.mxu0 %vm3430_vm1, %v3429_v2 }
 0x643   : > { %3160 = vmatprep.subr.bf16.mxu0 %v3429_v2 }
 0x646   : > { %3161 = vmatpush3.bf16.msra.mxu0 %v3364_v55 }
 0x647   : > { %3174 = vmatprep.subr.bf16.mxu0 %v3429_v2 }
 0x6f1   : > { %v1820_v9 = vpop.f32.mrf.mxu1 }
 0x6f3   : > { %v1822_v1 = vpop.f32.mrf.mxu1 }
 0x6f4   : > { %v1829_v57 = vcombine.low %v1820_v9, %v1822_v1 }
 0x6f5   : > { %v1824_v58 = vpop.f32.mrf.mxu1 }
 0x6f6   : > { %v1836_v54 = vrot.slane %v1829_v57, %v3633_v7 }
 0x6f7   : > { %v1825_v3 = vpop.f32.mrf.mxu1 }
 0x6f8   : > { %v1838_v60 = vadd.f32 %v1836_v54, %v1756_v59 }
 0x6f9   : > { %v1879_v61 = vpop.f32.mrf.mxu0  ;;  %v1919_v63 = vpop.f32.mrf.mxu1 }
 0x6fa   : > { %1839 = vst [vmem:[#allocation3] sm:$0xf] %v1838_v60  ;;  %v1880_v4 = vadd.f32 %v3579_v15, %v1879_v61  ;;  %v1920_v19 = vadd.f32 %v3585_v18, %v1919_v63  ;;  %v3366_v60 = vld [vmem:[%s4020_s2 + $0x1] ss:$0 sm:$0xff] }
 0x6fb   : > { %v3140_v10 = vpop.f32.mrf.mxu0  ;;  %v3148_v11 = vpop.f32.mrf.mxu1 }
 0x6fc   : > { %v1969_v12 = vadd.f32 %v2824_v62, %v1880_v4  ;;  %v1976_v24 = vadd.f32 %v2825_v20, %v1920_v19  ;;  %v2842_v62 = vld [vmem:[%s3505_s19 + $0x2c] sm:$0x3] }
 0x6fd   : > { %v1882_v14 = vpop.f32.mrf.mxu0  ;;  %v1922_v16 = vpop.f32.mrf.mxu1 }
 0x6fe   : > { %v2827_v17 = vmul.f32 -1.442695, %v1969_v12  ;;  %v2828_v27 = vmul.f32 -1.442695, %v1976_v24 }
 0x6ff   : > { %v3141_v21 = vpop.f32.mrf.mxu0  ;;  %v3149_v22 = vpop.f32.mrf.mxu1 }
 0x700   : > { %3339 = vpow2.f32 %v2827_v17 }
 0x701   : > { %v1959_v23 = vpop.f32.mrf.mxu0  ;;  %3341 = vpow2.f32 %v2828_v27 }
 0x702   : > { %v1960_v32 = vadd.f32 %v3593_v40, %v1959_v23  ;;  %v3367_v23 = vld [vmem:[%s4020_s2 + $0x2] ss:$0 sm:$0xff] }
 0x703   : > { %v3156_v25 = vpop.f32.mrf.mxu0 }
 0x705   : > { %v1962_v26 = vpop.f32.mrf.mxu0 }
 0x706   : > { %v2843_v26 = vld [vmem:[%s3505_s19 + $0x2e] sm:$0x3] }
 0x707   : > { %v3157_v28 = vpop.f32.mrf.mxu0 }
 0x70d   : > { %v3340_v15 = vpop.eup %3339 }
 0x70e   : > { %v1973_v29 = vadd.f32 1.0, %v3340_v15  ;;  %v3342_v30 = vpop.eup %3341 }
 0x70f   : > { %v1980_v31 = vadd.f32 1.0, %v3342_v30 }
 0x710   : > { %3343 = vrcp.f32 %v1973_v29 }
 0x711   : > { %3345 = vrcp.f32 %v1980_v31 }
 0x71d   : > { %v3344_v18 = vpop.eup %3343 }
 0x71e   : > { %v1983_v34 = vmul.f32 %v3344_v18, %v1960_v32  ;;  %v3346_v36 = vpop.eup %3345 }
 0x71f   : > { %v1986_v37 = vsub.f32 1.0, %v3346_v36  ;;  %v1988_v41 = vmul.f32 %v3346_v36, %v3820_v49 }
 0x720   : > { %v1984_v35 = vadd.f32 %v2826_v33, %v1983_v34 }
 0x722   : > { %3347 = vtanh.f32 %v1984_v35 }
 0x72f   : > { %v3348_v38 = vpop.eup %3347 }
 0x730   : > { %v1987_v39 = vmul.f32 %v3348_v38, %v1986_v37 }
 0x732   : > { %v1989_v42 = vadd.f32 %v1988_v41, %v1987_v39 }
 0x734   : > { %v1992_v43 = vpack.c.bf16 %v1989_v42, %v1989_v42  ;;  %1990 = vst.msk [vmem:[#allocation2] sm:$0x3] %vm580_vm3, %v1989_v42 }
 0x736   : > { %2837 = vmatmul.mubr.msk.bf16.vlgmr.msra.gmra.mxu1 %vm396_vm2, %v1992_v43 }
 0x737   : > { %3167 = vmatpush3.bf16.msra.mxu1 %v3808_v47  ;;  %3170 = vmatprep.mubr.msk.bf16.mxu1 %vm3430_vm1, %v3429_v2  ;;  %v3278_v47 = vld [vmem:[%s3500_s16 + $0xe4] ss:$8 sps:$4 sm:$0xff]  }
 0x738   : > { %3168 = vmatprep.subr.bf16.mxu1 %v3429_v2 }
 0x73b   : > { %3169 = vmatpush3.bf16.msra.mxu1 %v3817_v48  ;;  %v3874_v40 = vld [vmem:[#allocation2] sm:$0x3] }
 0x73c   : > { %v2076_v44 = vpack.c.bf16 %v3874_v40, %v3874_v40  ;;  %2268 = vmatprep.subr.bf16.mxu1 %v3275_v46  ;;  %v3276_v48 = vld [vmem:[%s3500_s16 + $0xe0] ss:$8 sps:$4 sm:$0xff]  }
 0x73e   : > { %3163 = vmatmul.mubr.msk.bf16.vlgmr.msra.gmra.mxu0 %vm396_vm2, %v2076_v44  ;;  %3171 = vmatmul.mubr.msk.bf16.vlgmr.msra.gmra.mxu1 %vm396_vm2, %v2076_v44 }
 0x73f   : > { %3175 = vmatpush3.bf16.msra.mxu0 %v3829_v51  ;;  %3178 = vmatprep.mubr.msk.bf16.mxu0 %vm3430_vm1, %v3429_v2 }
 0x740   : > { %3176 = vmatprep.subr.bf16.mxu0 %v3429_v2  ;;  %2288 = vmatprep.mubr.bf16.mxu1 %v3431_v13  ;;  %v1991_v13 = vld [vmem:[#allocation3] sm:$0xf] }
 0x741   : > { %2269 = vmatpush1.bf16.msra.mxu1 %v3273_v45 }
 0x742   : > { %2270 = vmatprep.subr.bf16.mxu1 %v3278_v47 }
 0x743   : > { %3177 = vmatpush3.bf16.msra.mxu0 %v3839_v52 }
 0x745   : > { %2271 = vmatpush1.bf16.msra.mxu1 %v3276_v48 }
 0x746   : > { %3179 = vmatmul.mubr.msk.bf16.vlgmr.msra.gmra.mxu0 %vm396_vm2, %v2076_v44 }
 0x7f6   : > { %v2055_v49 = vpop.f32.mrf.mxu1 }
 0x7f8   : > { %v2057_v50 = vpop.f32.mrf.mxu1 }
 0x7f9   : > { %v2064_v51 = vcombine.low %v2055_v49, %v2057_v50 }
 0x7fa   : > { %v2059_v53 = vpop.f32.mrf.mxu1 }
 0x7fb   : > { %v2071_v2 = vrot.slane %v2064_v51, %v3633_v7 }
 0x7fc   : > { %v2060_v55 = vpop.f32.mrf.mxu1 }
 0x7fd   : > { %v2073_v52 = vadd.f32 %v2071_v2, %v1991_v13 }
 0x7fe   : > { %v2114_v56 = vpop.f32.mrf.mxu0  ;;  %v2154_v6 = vpop.f32.mrf.mxu1 }
 0x7ff   : > { %2074 = vst [vmem:[#allocation3] sm:$0xf] %v2073_v52  ;;  %v2115_v9 = vadd.f32 %v3365_v8, %v2114_v56  ;;  %v2155_v61 = vadd.f32 %v3366_v60, %v2154_v6 }
 0x800   : > { %v3164_v1 = vpop.f32.mrf.mxu0  ;;  %v3172_v57 = vpop.f32.mrf.mxu1 }
 0x801   : > { %v2204_v58 = vadd.f32 %v2841_v5, %v2115_v9  ;;  %v2211_v11 = vadd.f32 %v2842_v62, %v2155_v61 }
 0x802   : > { %v2117_v54 = vpop.f32.mrf.mxu0  ;;  %v2157_v59 = vpop.f32.mrf.mxu1 }
 0x803   : > { %v2844_v3 = vmul.f32 -1.442695, %v2204_v58  ;;  %v2845_v16 = vmul.f32 -1.442695, %v2211_v11 }
 0x804   : > { %v3165_v63 = vpop.f32.mrf.mxu0  ;;  %v3173_v4 = vpop.f32.mrf.mxu1 }
 0x805   : > { %3349 = vpow2.f32 %v2844_v3 }
 0x806   : > { %v2194_v10 = vpop.f32.mrf.mxu0  ;;  %3351 = vpow2.f32 %v2845_v16  ;;  %v2226_v39 = vld [vmem:[#allocation3] sm:$0xf] }
 0x807   : > { %v2195_v24 = vadd.f32 %v3367_v23, %v2194_v10 }
 0x808   : > { %v3180_v12 = vpop.f32.mrf.mxu0 }
 0x80a   : > { %v2197_v14 = vpop.f32.mrf.mxu0 }
 0x80c   : > { %v3181_v17 = vpop.f32.mrf.mxu0 }
 0x812   : > { %v3350_v19 = vpop.eup %3349 }
 0x813   : > { %v2208_v20 = vadd.f32 1.0, %v3350_v19  ;;  %v3352_v21 = vpop.eup %3351 }
 0x814   : > { %v2215_v22 = vadd.f32 1.0, %v3352_v21 }
 0x815   : > { %3353 = vrcp.f32 %v2208_v20 }
 0x816   : > { %3355 = vrcp.f32 %v2215_v22 }
 0x822   : > { %v3354_v25 = vpop.eup %3353 }
 0x823   : > { %v2218_v27 = vmul.f32 %v3354_v25, %v2195_v24  ;;  %v3356_v15 = vpop.eup %3355 }
 0x824   : > { %v2221_v29 = vsub.f32 1.0, %v3356_v15  ;;  %v2223_v32 = vmul.f32 %v3356_v15, %v3874_v40 }
 0x825   : > { %v2219_v28 = vadd.f32 %v2843_v26, %v2218_v27 }
 0x827   : > { %3357 = vtanh.f32 %v2219_v28 }
 0x834   : > { %v3358_v30 = vpop.eup %3357 }
 0x835   : > { %v2222_v31 = vmul.f32 %v3358_v30, %v2221_v29 }
 0x837   : > { %v2224_v18 = vadd.f32 %v2223_v32, %v2222_v31 }
 0x839   : > { %2225 = vst.msk [vmem:[#allocation2] sm:$0x3] %vm580_vm3, %v2224_v18  ;;  %v2227_v33 = vpack.c.bf16 %v2224_v18, %v2224_v18 }
 0x83b   : > { %2854 = vmatmul.mubr.msk.bf16.vlgmr.msra.gmra.mxu1 %vm396_vm2, %v2227_v33 }
 0x8fb   : > { %v2290_v34 = vpop.f32.mrf.mxu1 }
 0x8fd   : > { %v2292_v35 = vpop.f32.mrf.mxu1 }
 0x8fe   : > { %v2299_v36 = vcombine.low %v2290_v34, %v2292_v35 }
 0x8ff   : > { %v2294_v37 = vpop.f32.mrf.mxu1 }
 0x900   : > { %v2306_v38 = vrot.slane %v2299_v36, %v3633_v7  ;;  %2313 = sbr.rel (%p2855_p5) target bundleno = 2744 (0xab8), region = 64 }
 0x901   : > { %v2295_v41 = vpop.f32.mrf.mxu1 }
 0x902   : > { %v2308_v42 = vadd.f32 %v2306_v38, %v2226_v39 }
 0x904   : > { %2309 = vst [vmem:[#allocation3] sm:$0xf] %v2308_v42 }
 0x905   : > { %v3368_v43 = vld [vmem:[%s4023_s5 + $0x78] sm:$0xff]   ;;  %v3370_v44 = vld [vmem:[%s4023_s5 + $0x70] sm:$0xff]   ;;  %v3433_v46 = vmov 0.0   ;;  %v3372_v47 = vld [vmem:[%s4023_s5 + $0x68] sm:$0xff]   ;;  %v2319_v53 = vsub.s32 0, %v3630_v0  ;;  %v2323_v2 = vsub.s32 1, %v3630_v0 }
 0x906   : > { %v3369_v40 = vld [vmem:[%s4023_s5 + $0x38] sm:$0xff]   ;;  %2959 = vmatprep.subr.bf16.mxu0 %v3368_v43  ;;  %v3371_v45 = vld [vmem:[%s4023_s5 + $0x30] sm:$0xff]   ;;  %3182 = vmatprep.subr.bf16.mxu1 %v3433_v46  ;;  %v3373_v48 = vld [vmem:[%s4023_s5 + $0x28] sm:$0xff]   ;;  %vm3434_vm4 = vmmov 0   ;;  %vm2637_vm5 = vcmask 41984  }
 0x907   : > { %2960 = vmatpush3.bf16.msra.mxu0 %v3369_v40  ;;  %v3374_v49 = vld [vmem:[%s4023_s5 + $0x60] sm:$0xff]   ;;  %v3376_v51 = vld [vmem:[%s4023_s5 + $0x58] sm:$0xff]   ;;  %v3378_v55 = vld [vmem:[%s4023_s5 + $0x50] sm:$0xff]   ;;  %3198 = vmatprep.mubr.msk.bf16.mxu1 %vm3434_vm4, %v3433_v46 }
 0x908   : > { %2961 = vmatprep.subr.bf16.mxu0 %v3370_v44  ;;  %v3375_v50 = vld [vmem:[%s4023_s5 + $0x20] sm:$0xff]   ;;  %v3377_v13 = vld [vmem:[%s4023_s5 + $0x18] sm:$0xff]   ;;  %v3379_v56 = vld [vmem:[%s4023_s5 + $0x10] sm:$0xff]  }
 0x909   : > { %v2315_v52 = vld [vmem:[%s4022_s4] sm:$0x3]  ;;  %v3384_v6 = vld [vmem:[%s4025_s7 + $0x38] sm:$0xff]   ;;  %v3380_v8 = vld [vmem:[%s4023_s5 + $0x48] sm:$0xff]  }
 0x90a   : > { %v2320_v5 = vrot.slane %v2315_v52, %v2319_v53  ;;  %v2324_v0 = vrot.slane %v2315_v52, %v2323_v2  ;;  %3183 = vmatpush3.bf16.msra.mxu1 %v3384_v6  ;;  %v3385_v1 = vld [vmem:[%s4025_s7 + $0x30] sm:$0xff]   ;;  %v3381_v58 = vld [vmem:[%s4023_s5 + $0x8] sm:$0xff]   ;;  %v3382_v60 = vld [vmem:[%s4023_s5 + $0x40] sm:$0xff]  }
 0x90b   : > { %2962 = vmatpush3.bf16.msra.mxu0 %v3371_v45  ;;  %v2314_v57 = vld [vmem:[#allocation3] sm:$0xf]  ;;  %3184 = vmatprep.subr.bf16.mxu1 %v3433_v46  ;;  %v3386_v3 = vld [vmem:[%s4025_s7 + $0x28] sm:$0xff]   ;;  %v3388_v14 = vld [vmem:[%s4025_s7 + $0x18] sm:$0xff]  }
 0x90c   : > { %2963 = vmatprep.subr.bf16.mxu0 %v3372_v47  ;;  %v2325_v9 = vcombine.low %v2320_v5, %v2324_v0  ;;  %v3383_v62 = vld [vmem:[%s4023_s5] sm:$0xff]   ;;  %v3390_v16 = vld [vmem:[%s4025_s7 + $0x8] sm:$0xff]  }
 0x90d   : > { %v3387_v4 = vld [vmem:[%s4025_s7 + $0x20] sm:$0xff]  }
 0x90e   : > { %v2332_v54 = vrot.slane %v2325_v9, %v3633_v7  ;;  %3185 = vmatpush3.bf16.msra.mxu1 %v3385_v1  ;;  %v3391_v17 = vld [vmem:[%s4025_s7] sm:$0xff]  }
 0x90f   : > { %2964 = vmatpush3.bf16.msra.mxu0 %v3373_v48  ;;  %3186 = vmatprep.subr.bf16.mxu1 %v3433_v46  ;;  %v2856_v20 = vld [vmem:[%s4024_s6] ss:$0 sm:$0xff] }
 0x910   : > { %2965 = vmatprep.subr.bf16.mxu0 %v3374_v49  ;;  %v2334_v59 = vadd.f32 %v2332_v54, %v2314_v57  ;;  %v2873_v28 = vld [vmem:[%s4026_s8] ss:$0 sm:$0xff] }
 0x912   : > { %v2335_v61 = vmax.f32 %v2334_v59, 0.0  ;;  %3187 = vmatpush3.bf16.msra.mxu1 %v3386_v3 }
 0x913   : > { %2966 = vmatpush3.bf16.msra.mxu0 %v3375_v50  ;;  %3188 = vmatprep.subr.bf16.mxu1 %v3433_v46 }
 0x914   : > { %2967 = vmatprep.subr.bf16.mxu0 %v3376_v51  ;;  %v2343_v63 = vrot.slane %v2335_v61, %v3633_v7  ;;  %v3389_v7 = vld [vmem:[%s4025_s7 + $0x10] sm:$0xff]  }
 0x916   : > { %v2344_v10 = vcombine.high %v2343_v63, %v2343_v63  ;;  %v2347_v11 = vpack.c.bf16 %v2343_v63, %v2343_v63  ;;  %3189 = vmatpush3.bf16.msra.mxu1 %v3387_v4 }
 0x917   : > { %2968 = vmatpush3.bf16.msra.mxu0 %v3377_v13  ;;  %3190 = vmatprep.subr.bf16.mxu1 %v3433_v46 }
 0x918   : > { %2969 = vmatprep.subr.bf16.mxu0 %v3378_v55  ;;  %v2348_v12 = vpack.c.bf16 %v2344_v10, %v2344_v10 }
 0x91a   : > { %2516 = vmatprep.mubr.bf16.mxu0 %v2348_v12  ;;  %3191 = vmatpush3.bf16.msra.mxu1 %v3388_v14 }
 0x91b   : > { %2970 = vmatpush3.bf16.msra.mxu0 %v3379_v56  ;;  %3192 = vmatprep.subr.bf16.mxu1 %v3433_v46 }
 0x91c   : > { %2971 = vmatprep.subr.bf16.mxu0 %v3380_v8 }
 0x91e   : > { %3193 = vmatpush3.bf16.msra.mxu1 %v3389_v7 }
 0x91f   : > { %2972 = vmatpush3.bf16.msra.mxu0 %v3381_v58  ;;  %3194 = vmatprep.subr.bf16.mxu1 %v3433_v46 }
 0x920   : > { %2973 = vmatprep.subr.bf16.mxu0 %v3382_v60 }
 0x922   : > { %3195 = vmatpush3.bf16.msra.mxu1 %v3390_v16 }
 0x923   : > { %2974 = vmatpush3.bf16.msra.mxu0 %v3383_v62  ;;  %3196 = vmatprep.subr.bf16.mxu1 %v3433_v46 }
 0x926   : > { %2517 = vmatmul.mubr.bf16.vlgmr.msra.gmra.mxu0 %v2347_v11  ;;  %3197 = vmatpush3.bf16.msra.mxu1 %v3391_v17 }
 0x9e6   : > { %v2975_v19 = vpop.f32.mrf.mxu0 }
 0x9e8   : > { %v2976_v21 = vpop.f32.mrf.mxu0 }
 0x9e9   : > { %v2977_v22 = vadd.f32 %v2976_v21, %v2975_v19 }
 0x9ea   : > { %v2978_v23 = vpop.f32.mrf.mxu0 }
 0x9eb   : > { %v2519_v24 = vadd.f32 %v2977_v22, %v2856_v20 }
 0x9ec   : > { %v2979_v25 = vpop.f32.mrf.mxu0 }
 0x9ed   : > { %v2524_v26 = vmax.f32 %v2519_v24, 0.0 }
 0x9ef   : > { %v2525_v27 = vpack.c.bf16 %v2524_v26, %v2524_v26 }
 0x9f1   : > { %3199 = vmatmul.mubr.bf16.vlgmr.msra.gmra.mxu1 %v2525_v27 }
 0xab1   : > { %v2631_v15 = vpop.f32.mrf.mxu1 }
 0xab2   : > { %v2632_v29 = vadd.f32 %v2873_v28, %v2631_v15 }
 0xab3   : > { %v3200_v30 = vpop.f32.mrf.mxu1 }
 0xab4   : > { %2638 = vst.msk [vmem:[#allocation4] sm:$0x3] %vm2637_vm5, %v2632_v29 }
 0xab5   : > { %v2634_v31 = vpop.f32.mrf.mxu1 }
 0xab7   : > { %v3201_v32 = vpop.f32.mrf.mxu1 }
 0xab8 PF: > { %p3207_p6 = scmp.eq.s32.totalorder %s3492_s10, 1  ;;  %s3435_s17 = smov [#allocation4]  }
 0xab9   : > { %s2646_s18 = sshll.u32 %s3435_s17, 4  ;;  %s2647_s18 = int_to_ptr.vmem [resolvable:$true] %s2646_s18 }
 0xaba   : > { %s3392_s20 = scalar_lea.vmem %s2647_s18, 32  ;;  %p3399_p10 = scmp.lt.s32.totalorder %s2647_s18, %s2647_s18 }
 0xabb   : > { %p3393_p7 = scmp.ne.s32.totalorder %s2647_s18, %s3392_s20  ;;  %p3400_p11 = scmp.lt.s32.totalorder %s3392_s20, %s3392_s20 }
 0xabd   : > { %p3394_p8 = pnand %p3393_p7, %p3207_p6  ;;  %p3401_p12 = por %p3400_p11, %p3399_p10 }
 0xabf   : > { %p3395_p9 = pneg %p3394_p8 }
 0xac1   : > { %p3402_p13 = pnand %p3401_p12, %p3395_p9 }
 0xac3   : > { %3405 = shalt.err (!%p3402_p13)
}
 0xac4   : > { %3204 = dma.vmem_to_hbm [thread:$0]  (%p3207_p6), %s2647_s18, 32, %s4027_s9, [#allocation5]  }
 0xac5   : > { %3421 = dma.done.wait (%p3207_p6), [#allocation5], 32  }
 0xac6   : > { %3423 = vsyncadd (%p3207_p6), [#allocation5], 4294967264 }
 0xac7 PF: > { %s20_s30 = sadd.s32 1, %s3426_s30  }
 0xac8   : > { %p17_p0 = scmp.ge.s32.totalorder %s20_s30, 4  }
 0xaca   :  { %19 = sbr.rel (!%p17_p0) target bundleno = 1 (0x1), region = 112 }
 0xacf   :  { %2659 = vsyncpa [#allocation5], 1 }
 0xad0   :  { %2661 = vsyncpa [#allocation5 + $0x1], 1 }

</bundles_post_ra>
